<compile_context>
chip_gen: v7x
topology: tpu7x:2x2x1
jax: 0.10.0
libtpu: 0.0.40
codegen_flags: <defaults>
</compile_context>

<pallas_src>
import numpy as np
import jax
import jax.numpy as jnp
from jax import lax
from jax.experimental import pallas as pl
from jax.experimental.pallas import tpu as pltpu

# ---------------- model hyper-parameters (small, consistent with the module) ----
MAX_FEATURES  = 50
VOCAB         = MAX_FEATURES + 3          # 53
EMBEDDING_DIM = 16
SEQ_LENGTH    = 24
NB_FILTER     = 8
FILTER_LENGTH = 5
POOL_LENGTH   = 4
HIDDEN_SIZE   = 32
BATCH         = 2                         # example batch (kernel handles any B via tiling)

CNN_OUT_LEN  = SEQ_LENGTH - FILTER_LENGTH + 1                    # 20
POOL_OUT_LEN = (CNN_OUT_LEN - POOL_LENGTH) // POOL_LENGTH + 1    # 5
FLAT_LEN     = POOL_OUT_LEN * NB_FILTER                          # 40

# ---------------- kernel tiling -------------------------------------------------
B_TILE    = 128                            # batch elements per grid step (lane axis fully dense)
N_TILE    = SEQ_LENGTH * B_TILE            # 3072 lanes, n = s*B_TILE + b (s-major)
OUT_LANES = B_TILE

# ---------------- packed-parameter layout: one (PACK_ROWS, 128) f32 buffer -----
def _rup8(x):
    return ((x + 7) // 8) * 8

PARAM_LANES = 128
HID_ROWS    = _rup8(HIDDEN_SIZE)                                 # 32
ROW_EMB = 0                                                      # emb^T   (E, V)    rows 0:16
ROW_WC  = ROW_EMB + _rup8(EMBEDDING_DIM)                         # conv W  (F, K*E)  rows 16:24
ROW_BC  = ROW_WC + _rup8(NB_FILTER)                              # conv b  (F, 1)    rows 24:32
ROW_W1  = ROW_BC + _rup8(NB_FILTER)                              # W1 blocks p=0..P-1, each (H, F)
ROW_B1  = ROW_W1 + POOL_OUT_LEN * HID_ROWS                       # b1      (H, 1)    rows 192:224
ROW_W2  = ROW_B1 + HID_ROWS                                      # w2      (1, H)    row 224
ROW_B2  = ROW_W2 + 8                                             # b2      (1, 1)    row 232
PACK_ROWS = ROW_B2 + 8                                           # 240 rows total

# ---- static safety asserts (pltpu.roll wrap-around lanes must never be selected) ----
assert CNN_OUT_LEN == SEQ_LENGTH - FILTER_LENGTH + 1
# last conv position read by any pool window stays inside the conv output ...
assert (POOL_OUT_LEN - 1) * POOL_LENGTH + (POOL_LENGTH - 1) <= CNN_OUT_LEN - 1
# ... and the last input token it touches stays inside the sequence (no wrap reaches it)
assert (POOL_OUT_LEN - 1) * POOL_LENGTH + (POOL_LENGTH - 1) + (FILTER_LENGTH - 1) <= SEQ_LENGTH - 1
assert N_TILE % 128 == 0 and B_TILE % 128 == 0
assert VOCAB <= PARAM_LANES
assert FILTER_LENGTH * EMBEDDING_DIM <= PARAM_LANES
assert HIDDEN_SIZE <= PARAM_LANES and PACK_ROWS % 8 == 0


def pre_kernel(ids_ref, prm_ref, out_ref):
    """Fused embedding + conv1d + maxpool1d + linear/relu + linear/sigmoid for one batch tile."""
    ids = ids_ref[0]                                             # (1, N_TILE) int32, n = s*B_TILE + b

    # ---- embedding gather as a one-hot matmul with a 128-wide (vreg-native) vocab axis.
    # Table lanes >= VOCAB are zero and their one-hot rows are never hit, so the padding
    # of the contraction dimension to 128 is exact.
    emb_t = prm_ref[ROW_EMB:ROW_EMB + EMBEDDING_DIM, :]          # (E, 128)
    vocab_iota = lax.broadcasted_iota(jnp.int32, (PARAM_LANES, N_TILE), 0)
    onehot = (vocab_iota == ids).astype(jnp.float32)             # (128, N)
    x = jnp.dot(emb_t, onehot, preferred_element_type=jnp.float32)   # (E, N)

    # ---- Conv1d (valid, stride 1) as ONE im2col matmul.
    # s-major lane layout => a time shift of +k is a lane rotation by k*B_TILE (XLU roll,
    # no zero-pad/concat along lanes). Wrapped lanes only land at s >= CNN_OUT_LEN, which
    # no pool window selects (guaranteed by the module-level asserts).
    shifted = [x] + [pltpu.roll(x, N_TILE - k * B_TILE, axis=1)
                     for k in range(1, FILTER_LENGTH)]
    patches = jnp.concatenate(shifted, axis=0)                   # (K*E, N), row index k*E + c
    wc = prm_ref[ROW_WC:ROW_WC + NB_FILTER, 0:FILTER_LENGTH * EMBEDDING_DIM]   # (F, K*E)
    bc = prm_ref[ROW_BC:ROW_BC + NB_FILTER, 0:1]                               # (F, 1)
    acc = jnp.dot(wc, patches, preferred_element_type=jnp.float32) + bc        # (F, N)

    # ---- MaxPool1d(kernel=stride=POOL_LENGTH) as a running-window max over lane rolls.
    m = acc
    for j in range(1, POOL_LENGTH):
        m = jnp.maximum(m, pltpu.roll(acc, N_TILE - j * B_TILE, axis=1))       # (F, N)

    # ---- c_linear1 + ReLU fused with the channel-major flatten (torch .view (B, F*P)):
    # hT[h, b] = sum_p sum_f W1[h, f*P + p] * pooled_p[f, b], batch kept on lanes so the
    # (F, P) -> (F*P,) sublane->lane relayout never happens. pooled_p is a 128-aligned
    # contiguous lane slice (pool window start s = p*POOL -> lane offset p*POOL*B_TILE).
    hT = jnp.zeros((HIDDEN_SIZE, B_TILE), jnp.float32)
    for p in range(POOL_OUT_LEN):
        col = p * POOL_LENGTH * B_TILE
        pooled_p = m[:, col:col + B_TILE]                                       # (F, B_TILE)
        w1_p = prm_ref[ROW_W1 + p * HID_ROWS:ROW_W1 + p * HID_ROWS + HIDDEN_SIZE,
                       0:NB_FILTER]                                             # (H, F)
        hT = hT + jnp.dot(w1_p, pooled_p, preferred_element_type=jnp.float32)
    hT = jnp.maximum(hT + prm_ref[ROW_B1:ROW_B1 + HIDDEN_SIZE, 0:1], 0.0)       # (H, B_TILE)

    # ---- linear2 + Sigmoid, still batch-on-lanes; full unmasked (8,128) store.
    w2 = prm_ref[ROW_W2:ROW_W2 + 1, 0:HIDDEN_SIZE]                              # (1, H)
    b2 = prm_ref[ROW_B2:ROW_B2 + 1, 0:1]                                        # (1, 1)
    z = jnp.dot(w2, hT, preferred_element_type=jnp.float32) + b2                # (1, B_TILE)
    prob = 1.0 / (1.0 + jnp.exp(-z))
    out_ref[...] = jnp.broadcast_to(prob, out_ref.shape)                        # (1, 8, B_TILE)


def pack_params(params):
    """One-time host-side packing of all torch-style params into a single (240,128) buffer."""
    buf = np.zeros((PACK_ROWS, PARAM_LANES), np.float32)
    emb = np.asarray(params['emb'])                                   # (V, E)
    buf[ROW_EMB:ROW_EMB + EMBEDDING_DIM, :VOCAB] = emb.T
    wc = np.asarray(params['c_cnn_w'])                                # (F, E, K)
    buf[ROW_WC:ROW_WC + NB_FILTER, :FILTER_LENGTH * EMBEDDING_DIM] = (
        np.transpose(wc, (0, 2, 1)).reshape(NB_FILTER, FILTER_LENGTH * EMBEDDING_DIM))
    buf[ROW_BC:ROW_BC + NB_FILTER, 0] = np.asarray(params['c_cnn_b'])
    w1 = np.asarray(params['c_lin1_w'])                               # (H, F*P), flat idx f*P + p
    for p in range(POOL_OUT_LEN):
        buf[ROW_W1 + p * HID_ROWS:ROW_W1 + p * HID_ROWS + HIDDEN_SIZE,
            :NB_FILTER] = w1[:, p::POOL_OUT_LEN]                      # (H, F) block for this p
    buf[ROW_B1:ROW_B1 + HIDDEN_SIZE, 0] = np.asarray(params['c_lin1_b'])
    buf[ROW_W2, :HIDDEN_SIZE] = np.asarray(params['lin2_w'])[0]
    buf[ROW_B2, 0] = np.asarray(params['lin2_b'])[0]
    return jnp.asarray(buf)


@jax.jit
def pre_forward(token_ids, packed_params):
    """token_ids: (SEQ_LENGTH, B) int ids (same (seq, batch) convention as the torch model)."""
    S, B = token_ids.shape
    assert S == SEQ_LENGTH
    nt = -(-B // B_TILE)                               # number of batch tiles (grid steps)
    b_pad = nt * B_TILE
    ids = jnp.pad(token_ids.astype(jnp.int32), ((0, 0), (0, b_pad - B)))
    # per-tile lane layout n = s*B_TILE + b (s-major)
    ids = ids.reshape(S, nt, B_TILE).transpose(1, 0, 2).reshape(nt, 1, N_TILE)

    grid_spec = pltpu.PrefetchScalarGridSpec(
        num_scalar_prefetch=0,
        grid=(nt,),
        in_specs=[
            pl.BlockSpec((1, 1, N_TILE), lambda t: (t, 0, 0)),             # token ids (1 DMA / tile)
            pl.BlockSpec((PACK_ROWS, PARAM_LANES), lambda t: (0, 0)),      # packed params, resident
        ],
        out_specs=pl.BlockSpec((1, 8, OUT_LANES), lambda t: (t, 0, 0)),
    )
    flops = 2 * nt * (PARAM_LANES * EMBEDDING_DIM * N_TILE
                      + NB_FILTER * FILTER_LENGTH * EMBEDDING_DIM * N_TILE
                      + POOL_OUT_LEN * HIDDEN_SIZE * NB_FILTER * B_TILE
                      + HIDDEN_SIZE * B_TILE)
    bytes_accessed = 4 * (nt * N_TILE + PACK_ROWS * PARAM_LANES + nt * 8 * OUT_LANES)

    out = pl.pallas_call(
        pre_kernel,
        out_shape=jax.ShapeDtypeStruct((nt, 8, OUT_LANES), jnp.float32),
        grid_spec=grid_spec,
        compiler_params=pltpu.CompilerParams(
            dimension_semantics=("parallel",)),        # v7x: both TensorCores split the batch tiles
        cost_estimate=pl.CostEstimate(flops=flops, transcendentals=nt * B_TILE,
                                      bytes_accessed=bytes_accessed),
    )(ids, packed_params)
    return out[:, 0, :].reshape(b_pad, 1)[:B]


def init_params(key):
    """Torch-native parameter layouts."""
    ks = jax.random.split(key, 7)
    s = 0.1
    return {
        'emb':      jax.random.normal(ks[0], (VOCAB, EMBEDDING_DIM), jnp.float32) * s,
        'c_cnn_w':  jax.random.normal(ks[1], (NB_FILTER, EMBEDDING_DIM, FILTER_LENGTH), jnp.float32) * s,
        'c_cnn_b':  jax.random.normal(ks[2], (NB_FILTER,), jnp.float32) * s,
        'c_lin1_w': jax.random.normal(ks[3], (HIDDEN_SIZE, FLAT_LEN), jnp.float32) * s,
        'c_lin1_b': jax.random.normal(ks[4], (HIDDEN_SIZE,), jnp.float32) * s,
        'lin2_w':   jax.random.normal(ks[5], (1, HIDDEN_SIZE), jnp.float32) * s,
        'lin2_b':   jax.random.normal(ks[6], (1,), jnp.float32) * s,
    }


def pre_reference(token_ids, params):
    """Pure-JAX reference of the PyTorch default forward path (for validation)."""
    S, B = token_ids.shape
    emb = params['emb'][token_ids]                       # (S, B, E)
    x = jnp.transpose(emb, (1, 2, 0))                    # (B, E, S)
    w, b = params['c_cnn_w'], params['c_cnn_b']
    L = S - FILTER_LENGTH + 1
    conv = jnp.zeros((B, NB_FILTER, L), jnp.float32)
    for k in range(FILTER_LENGTH):
        conv = conv + jnp.einsum('fc,bcl->bfl', w[:, :, k], x[:, :, k:k + L])
    conv = conv + b.reshape(1, NB_FILTER, 1)
    P = (L - POOL_LENGTH) // POOL_LENGTH + 1
    pooled = conv[:, :, :P * POOL_LENGTH].reshape(B, NB_FILTER, P, POOL_LENGTH).max(-1)
    flat = pooled.reshape(B, NB_FILTER * P)
    h = jnp.maximum(flat @ params['c_lin1_w'].T + params['c_lin1_b'], 0.0)
    z = h @ params['lin2_w'].T + params['lin2_b']
    return jax.nn.sigmoid(z)


if __name__ == "__main__":
    key = jax.random.PRNGKey(0)
    pkey, tkey, tkey2 = jax.random.split(key, 3)
    params = init_params(pkey)
    packed = pack_params(params)

    # small example matching the module's default forward path (batch=2, seq=24)
    token_ids = jax.random.randint(tkey, (SEQ_LENGTH, BATCH), 0, VOCAB, jnp.int32)
    out = pre_forward(token_ids, packed)
    jax.block_until_ready(out)
    assert out.shape == (BATCH, 1)
    ref = pre_reference(token_ids, params)
    np.testing.assert_allclose(np.asarray(out), np.asarray(ref), rtol=1e-4, atol=1e-5)

    # multi-tile check: exercises the batch grid + "parallel" dimension semantics + padding
    big_b = 3 * B_TILE + 7
    token_ids2 = jax.random.randint(tkey2, (SEQ_LENGTH, big_b), 0, VOCAB, jnp.int32)
    out2 = pre_forward(token_ids2, packed)
    jax.block_until_ready(out2)
    ref2 = pre_reference(token_ids2, params)
    np.testing.assert_allclose(np.asarray(out2), np.asarray(ref2), rtol=1e-4, atol=1e-5)

    print("KERNEL_OK")
</pallas_src>

<mosaic_0001>
module attributes {stable_mosaic.version = 11 : i64} {
  func.func @pre_kernel(%arg0: i32, %arg1: memref<1x1x3072xi32, #tpu.memory_space<vmem>>, %arg2: memref<240x128xf32, #tpu.memory_space<vmem>>, %arg3: memref<1x8x128xf32, #tpu.memory_space<vmem>>) attributes {dimension_semantics = [#tpu.dimension_semantics<parallel>], iteration_bounds = array<i64: 1>, scalar_prefetch = 0 : i64, scratch_operands = 0 : i64, tpu.core_type = #tpu.core_type<tc>, window_params = [{transform_indices = @transform_0, window_bounds = array<i64: 1, 1, 3072>}, {pipeline_mode = #tpu.pipeline_mode<synchronous>, transform_indices = @transform_1, window_bounds = array<i64: 240, 128>}, {transform_indices = @transform_2, window_bounds = array<i64: 1, 8, 128>}]} {
    %c0 = arith.constant 0 : index
    %c0_0 = arith.constant 0 : index
    %c0_1 = arith.constant 0 : index
    %0 = vector.load %arg1[%c0, %c0_0, %c0_1] : memref<1x1x3072xi32, #tpu.memory_space<vmem>>, vector<1x1x3072xi32>
    %1 = vector.shape_cast %0 : vector<1x1x3072xi32> to vector<1x3072xi32>
    %c0_2 = arith.constant 0 : index
    %c0_3 = arith.constant 0 : index
    %2 = vector.load %arg2[%c0_2, %c0_3] : memref<240x128xf32, #tpu.memory_space<vmem>>, vector<16x128xf32>
    %3 = tpu.iota {dimensions = array<i32: 0>} : vector<128x3072xi32>
    %4 = vector.broadcast %1 : vector<1x3072xi32> to vector<128x3072xi32>
    %5 = arith.cmpi eq, %3, %4 : vector<128x3072xi32>
    %6 = arith.extui %5 : vector<128x3072xi1> to vector<128x3072xi32>
    %7 = arith.sitofp %6 : vector<128x3072xi32> to vector<128x3072xf32>
    %cst = arith.constant dense<0.000000e+00> : vector<16x3072xf32>
    %8 = tpu.matmul %2, %7, %cst {dimension_numbers = #tpu.dot_dimension_numbers<[1], [0], [0], [1], [0, 0, 1, 1], [], []>} : vector<16x128xf32>, vector<128x3072xf32>, vector<16x3072xf32> -> vector<16x3072xf32>
    %c2944_i32 = arith.constant 2944 : i32
    %9 = tpu.dynamic_rotate %8 by %c2944_i32 dim 1 : vector<16x3072xf32>, i32 -> vector<16x3072xf32>
    %c2816_i32 = arith.constant 2816 : i32
    %10 = tpu.dynamic_rotate %8 by %c2816_i32 dim 1 : vector<16x3072xf32>, i32 -> vector<16x3072xf32>
    %c2688_i32 = arith.constant 2688 : i32
    %11 = tpu.dynamic_rotate %8 by %c2688_i32 dim 1 : vector<16x3072xf32>, i32 -> vector<16x3072xf32>
    %c2560_i32 = arith.constant 2560 : i32
    %12 = tpu.dynamic_rotate %8 by %c2560_i32 dim 1 : vector<16x3072xf32>, i32 -> vector<16x3072xf32>
    %13 = tpu.concatenate %8, %9, %10, %11, %12 in 0 : vector<16x3072xf32>, vector<16x3072xf32>, vector<16x3072xf32>, vector<16x3072xf32>, vector<16x3072xf32> -> vector<80x3072xf32>
    %c16 = arith.constant 16 : index
    %c0_4 = arith.constant 0 : index
    %14 = vector.load %arg2[%c16, %c0_4] : memref<240x128xf32, #tpu.memory_space<vmem>>, vector<8x80xf32>
    %c24 = arith.constant 24 : index
    %c0_5 = arith.constant 0 : index
    %15 = vector.load %arg2[%c24, %c0_5] : memref<240x128xf32, #tpu.memory_space<vmem>>, vector<8x1xf32>
    %cst_6 = arith.constant dense<0.000000e+00> : vector<8x3072xf32>
    %16 = tpu.matmul %14, %13, %cst_6 {dimension_numbers = #tpu.dot_dimension_numbers<[1], [0], [0], [1], [0, 0, 1, 1], [], []>} : vector<8x80xf32>, vector<80x3072xf32>, vector<8x3072xf32> -> vector<8x3072xf32>
    %17 = vector.broadcast %15 : vector<8x1xf32> to vector<8x3072xf32>
    %18 = arith.addf %16, %17 : vector<8x3072xf32>
    %c2944_i32_7 = arith.constant 2944 : i32
    %19 = tpu.dynamic_rotate %18 by %c2944_i32_7 dim 1 : vector<8x3072xf32>, i32 -> vector<8x3072xf32>
    %20 = arith.maximumf %18, %19 : vector<8x3072xf32>
    %c2816_i32_8 = arith.constant 2816 : i32
    %21 = tpu.dynamic_rotate %18 by %c2816_i32_8 dim 1 : vector<8x3072xf32>, i32 -> vector<8x3072xf32>
    %22 = arith.maximumf %20, %21 : vector<8x3072xf32>
    %c2688_i32_9 = arith.constant 2688 : i32
    %23 = tpu.dynamic_rotate %18 by %c2688_i32_9 dim 1 : vector<8x3072xf32>, i32 -> vector<8x3072xf32>
    %24 = arith.maximumf %22, %23 : vector<8x3072xf32>
    %cst_10 = arith.constant 0.000000e+00 : f32
    %25 = vector.broadcast %cst_10 : f32 to vector<32x128xf32>
    %26 = vector.extract_strided_slice %24 {offsets = [0, 0], sizes = [8, 128], strides = [1, 1]} : vector<8x3072xf32> to vector<8x128xf32>
    %c32 = arith.constant 32 : index
    %c0_11 = arith.constant 0 : index
    %27 = vector.load %arg2[%c32, %c0_11] : memref<240x128xf32, #tpu.memory_space<vmem>>, vector<32x8xf32>
    %cst_12 = arith.constant dense<0.000000e+00> : vector<32x128xf32>
    %28 = tpu.matmul %27, %26, %cst_12 {dimension_numbers = #tpu.dot_dimension_numbers<[1], [0], [0], [1], [0, 0, 1, 1], [], []>} : vector<32x8xf32>, vector<8x128xf32>, vector<32x128xf32> -> vector<32x128xf32>
    %29 = arith.addf %25, %28 : vector<32x128xf32>
    %30 = vector.extract_strided_slice %24 {offsets = [0, 512], sizes = [8, 128], strides = [1, 1]} : vector<8x3072xf32> to vector<8x128xf32>
    %c64 = arith.constant 64 : index
    %c0_13 = arith.constant 0 : index
    %31 = vector.load %arg2[%c64, %c0_13] : memref<240x128xf32, #tpu.memory_space<vmem>>, vector<32x8xf32>
    %cst_14 = arith.constant dense<0.000000e+00> : vector<32x128xf32>
    %32 = tpu.matmul %31, %30, %cst_14 {dimension_numbers = #tpu.dot_dimension_numbers<[1], [0], [0], [1], [0, 0, 1, 1], [], []>} : vector<32x8xf32>, vector<8x128xf32>, vector<32x128xf32> -> vector<32x128xf32>
    %33 = arith.addf %29, %32 : vector<32x128xf32>
    %34 = vector.extract_strided_slice %24 {offsets = [0, 1024], sizes = [8, 128], strides = [1, 1]} : vector<8x3072xf32> to vector<8x128xf32>
    %c96 = arith.constant 96 : index
    %c0_15 = arith.constant 0 : index
    %35 = vector.load %arg2[%c96, %c0_15] : memref<240x128xf32, #tpu.memory_space<vmem>>, vector<32x8xf32>
    %cst_16 = arith.constant dense<0.000000e+00> : vector<32x128xf32>
    %36 = tpu.matmul %35, %34, %cst_16 {dimension_numbers = #tpu.dot_dimension_numbers<[1], [0], [0], [1], [0, 0, 1, 1], [], []>} : vector<32x8xf32>, vector<8x128xf32>, vector<32x128xf32> -> vector<32x128xf32>
    %37 = arith.addf %33, %36 : vector<32x128xf32>
    %38 = vector.extract_strided_slice %24 {offsets = [0, 1536], sizes = [8, 128], strides = [1, 1]} : vector<8x3072xf32> to vector<8x128xf32>
    %c128 = arith.constant 128 : index
    %c0_17 = arith.constant 0 : index
    %39 = vector.load %arg2[%c128, %c0_17] : memref<240x128xf32, #tpu.memory_space<vmem>>, vector<32x8xf32>
    %cst_18 = arith.constant dense<0.000000e+00> : vector<32x128xf32>
    %40 = tpu.matmul %39, %38, %cst_18 {dimension_numbers = #tpu.dot_dimension_numbers<[1], [0], [0], [1], [0, 0, 1, 1], [], []>} : vector<32x8xf32>, vector<8x128xf32>, vector<32x128xf32> -> vector<32x128xf32>
    %41 = arith.addf %37, %40 : vector<32x128xf32>
    %42 = vector.extract_strided_slice %24 {offsets = [0, 2048], sizes = [8, 128], strides = [1, 1]} : vector<8x3072xf32> to vector<8x128xf32>
    %c160 = arith.constant 160 : index
    %c0_19 = arith.constant 0 : index
    %43 = vector.load %arg2[%c160, %c0_19] : memref<240x128xf32, #tpu.memory_space<vmem>>, vector<32x8xf32>
    %cst_20 = arith.constant dense<0.000000e+00> : vector<32x128xf32>
    %44 = tpu.matmul %43, %42, %cst_20 {dimension_numbers = #tpu.dot_dimension_numbers<[1], [0], [0], [1], [0, 0, 1, 1], [], []>} : vector<32x8xf32>, vector<8x128xf32>, vector<32x128xf32> -> vector<32x128xf32>
    %45 = arith.addf %41, %44 : vector<32x128xf32>
    %c192 = arith.constant 192 : index
    %c0_21 = arith.constant 0 : index
    %46 = vector.load %arg2[%c192, %c0_21] : memref<240x128xf32, #tpu.memory_space<vmem>>, vector<32x1xf32>
    %47 = vector.broadcast %46 : vector<32x1xf32> to vector<32x128xf32>
    %48 = arith.addf %45, %47 : vector<32x128xf32>
    %cst_22 = arith.constant 0.000000e+00 : f32
    %49 = vector.broadcast %cst_22 : f32 to vector<32x128xf32>
    %50 = arith.maximumf %48, %49 : vector<32x128xf32>
    %c224 = arith.constant 224 : index
    %c0_23 = arith.constant 0 : index
    %51 = vector.load %arg2[%c224, %c0_23] : memref<240x128xf32, #tpu.memory_space<vmem>>, vector<1x32xf32>
    %c232 = arith.constant 232 : index
    %c0_24 = arith.constant 0 : index
    %52 = vector.load %arg2[%c232, %c0_24] : memref<240x128xf32, #tpu.memory_space<vmem>>, vector<1x1xf32>
    %cst_25 = arith.constant dense<0.000000e+00> : vector<1x128xf32>
    %53 = tpu.matmul %51, %50, %cst_25 {dimension_numbers = #tpu.dot_dimension_numbers<[1], [0], [0], [1], [0, 0, 1, 1], [], []>} : vector<1x32xf32>, vector<32x128xf32>, vector<1x128xf32> -> vector<1x128xf32>
    %54 = vector.broadcast %52 : vector<1x1xf32> to vector<1x128xf32>
    %55 = arith.addf %53, %54 : vector<1x128xf32>
    %cst_26 = arith.constant 0.000000e+00 : f32
    %56 = vector.broadcast %cst_26 : f32 to vector<1x128xf32>
    %57 = arith.subf %56, %55 : vector<1x128xf32>
    %58 = math.exp %57 : vector<1x128xf32>
    %cst_27 = arith.constant 1.000000e+00 : f32
    %59 = vector.broadcast %cst_27 : f32 to vector<1x128xf32>
    %60 = arith.addf %59, %58 : vector<1x128xf32>
    %cst_28 = arith.constant 1.000000e+00 : f32
    %61 = vector.broadcast %cst_28 : f32 to vector<1x128xf32>
    %62 = arith.divf %61, %60 : vector<1x128xf32>
    %63 = vector.shape_cast %62 : vector<1x128xf32> to vector<1x1x128xf32>
    %64 = vector.broadcast %63 : vector<1x1x128xf32> to vector<1x8x128xf32>
    %c0_29 = arith.constant 0 : index
    %c0_30 = arith.constant 0 : index
    %c0_31 = arith.constant 0 : index
    %65 = vector.load %arg3[%c0_29, %c0_30, %c0_31] : memref<1x8x128xf32, #tpu.memory_space<vmem>>, vector<1x8x128xf32>
    tpu.vector_store %arg3[%c0_29, %c0_30, %c0_31], %64 {strides = array<i32>} : memref<1x8x128xf32, #tpu.memory_space<vmem>>, vector<1x8x128xf32>,
    return
  }
  func.func @transform_0(%arg0: i32) -> (i32, i32, i32) {
    %c0_i32 = arith.constant 0 : i32
    %c0_i32_0 = arith.constant 0 : i32
    %c0_i32_1 = arith.constant 0 : i32
    return %arg0, %c0_i32, %c0_i32_0 : i32, i32, i32
  }
  func.func @transform_1(%arg0: i32) -> (i32, i32) {
    %c0_i32 = arith.constant 0 : i32
    %c0_i32_0 = arith.constant 0 : i32
    %c0_i32_1 = arith.constant 0 : i32
    return %c0_i32, %c0_i32_0 : i32, i32
  }
  func.func @transform_2(%arg0: i32) -> (i32, i32, i32) {
    %c0_i32 = arith.constant 0 : i32
    %c0_i32_0 = arith.constant 0 : i32
    %c0_i32_1 = arith.constant 0 : i32
    return %arg0, %c0_i32, %c0_i32_0 : i32, i32, i32
  }
}

</mosaic_0001>

<bundles_post_ra>
// kernel: pre_forward.1
= control target key start
LH: loop header
LB: loop body
LE: loop exit
PB: predicated region body
PF: predicated region fallthrough
CT: control target
= control target key end

     0   :  { %7 = vsyncpa [#allocation3], 0  ;;  %s5128_s9 = smov [#allocation2]   ;;  %s6461_s0 = inlined_call_operand.vmem [shape: s32[1,1,3072], index: 0, kind: input, shape index: {}]   ;;  %s6462_s1 = inlined_call_operand.hbm [shape: f32[240,128], index: 1, kind: input, shape index: {}]   ;;  %s6463_s2 = inlined_call_operand.vmem [shape: f32[1,8,128], index: 2, kind: output, shape index: {}]  }
   0x1   :  { %s15_s10 = sshll.u32 %s5128_s9, 4  ;;  %s5104_s13 = scalar_lea.hbm %s6462_s1, 3840  ;;  %s16_s10 = int_to_ptr.vmem [resolvable:$true] %s15_s10 }
   0x2   :  { %p5105_p0 = scmp.ne.s32.totalorder %s6462_s1, %s5104_s13  ;;  %p5108_p1 = scmp.lt.u32.totalorder %s5104_s13, %s6462_s1 }
   0x4   :  { %p5110_p2 = pnand %p5108_p1, %p5105_p0 }
   0x6   :  { %5113 = shalt.err (!%p5110_p2)
}
   0x7   :  { %s5114_s18 = scalar_lea.vmem %s16_s10, 3840  ;;  %p5119_p4 = scmp.lt.s32.totalorder %s16_s10, %s16_s10 }
   0x8   :  { %p5115_p3 = scmp.ne.s32.totalorder %s16_s10, %s5114_s18  ;;  %p5120_p5 = scmp.lt.s32.totalorder %s5114_s18, %s5114_s18 }
   0xa   :  { %p5121_p6 = por %p5120_p5, %p5119_p4 }
   0xc   :  { %p5122_p7 = pnand %p5121_p6, %p5115_p3 }
   0xe   :  { %5125 = shalt.err (!%p5122_p7)
}
   0xf   :  { %s5129_s19 = smov 128   ;;  %s5130_s20 = smov 8  }
  0x10   :  { %21 = dma.hbm_to_vmem [thread:$0]  %s6462_s1, 3840, %s16_s10, [#allocation3], %s5129_s19, %s5129_s19, %s5130_s20  }
  0x11   :  { %5126 = dma.done.wait [#allocation3], 3840  }
  0x12   :  { %5127 = vsyncadd [#allocation3], 4294963456  ;;  %v30_v0 = vlaneseq  ;;  %v5131_v1 = vmov 0.0   ;;  %v5185_v8 = vld [vmem:[%s6461_s0] sm:$0xff]  ;;  %v5132_v17 = vmov 1.0|1.0  }
  0x13   :  { %1359 = vmatprep.mubr.f32.mxu0 %v5131_v1  ;;  %1436 = vmatprep.mubr.f32.mxu1 %v5131_v1  ;;  %v5441_v36 = vld [vmem:[#allocation2] sm:$0xff]  ;;  %v5464_v37 = vld [vmem:[#allocation2 + $0x8] sm:$0xff]  ;;  %v5958_v47 = vld [vmem:[%s6461_s0 + $0x10] sm:$0xff] }
  0x14   :  { %v5165_v2 = vshrl.u32 %v30_v0, 7  ;;  %v5585_v38 = vld [vmem:[%s6461_s0 + $0x8] sm:$0xff]  ;;  %v6216_v56 = vld [vmem:[#allocation2] sm:$0xff] }
  0x15   :  { %v6241_v57 = vld [vmem:[#allocation2 + $0x8] sm:$0xff] }
  0x16   :  { %v5168_v3 = vsub.s32 1, %v5165_v2  ;;  %v5171_v4 = vsub.s32 0, %v5165_v2  ;;  %v5174_v5 = vsub.s32 3, %v5165_v2  ;;  %v5177_v6 = vsub.s32 2, %v5165_v2 }
  0x17   :  { %v5180_v7 = vadd.s32 8, %v5165_v2  ;;  %v5188_v9 = vadd.s32 16, %v5165_v2  ;;  %v5191_v10 = vadd.s32 24, %v5165_v2  ;;  %v5210_v15 = vadd.s32 32, %v5165_v2 }
  0x18   :  { %v5195_v11 = vrot.slane %v5185_v8, %v5168_v3  ;;  %v5199_v12 = vrot.slane %v5185_v8, %v5171_v4  ;;  %v5203_v13 = vrot.slane %v5185_v8, %v5174_v5  ;;  %v5207_v14 = vrot.slane %v5185_v8, %v5177_v6 }
  0x19   :  { %v5213_v16 = vadd.s32 40, %v5165_v2  ;;  %v5252_v18 = vadd.s32 48, %v5165_v2  ;;  %v5255_v19 = vadd.s32 56, %v5165_v2  ;;  %v5278_v20 = vadd.s32 64, %v5165_v2 }
  0x1a   :  { %vm144_vm0 = vcmp.eq.s32.totalorder %v5165_v2, %v5195_v11  ;;  %vm168_vm1 = vcmp.eq.s32.totalorder %v5180_v7, %v5195_v11  ;;  %vm143_vm2 = vcmp.eq.s32.totalorder %v5165_v2, %v5199_v12  ;;  %vm167_vm3 = vcmp.eq.s32.totalorder %v5180_v7, %v5199_v12 }
  0x1b   :  { %vm4482_vm4 = vmpackc.low %vm168_vm1, %vm144_vm0  ;;  %vm146_vm5 = vcmp.eq.s32.totalorder %v5165_v2, %v5203_v13  ;;  %vm170_vm6 = vcmp.eq.s32.totalorder %v5180_v7, %v5203_v13  ;;  %vm192_vm7 = vcmp.eq.s32.totalorder %v5188_v9, %v5195_v11  ;;  %vm216_vm8 = vcmp.eq.s32.totalorder %v5191_v10, %v5195_v11 }
  0x1c   :  { %4483 = vmatprep.subr.msk.bf16.mxu0 %vm4482_vm4, %v5132_v17  ;;  %vm4484_vm9 = vmpackc.low %vm167_vm3, %vm143_vm2  ;;  %vm145_vm10 = vcmp.eq.s32.totalorder %v5165_v2, %v5207_v14  ;;  %vm169_vm11 = vcmp.eq.s32.totalorder %v5180_v7, %v5207_v14  ;;  %vm191_vm13 = vcmp.eq.s32.totalorder %v5188_v9, %v5199_v12  ;;  %vm215_vm14 = vcmp.eq.s32.totalorder %v5191_v10, %v5199_v12 }
  0x1d   :  { %4485 = vmatpush1.bf16.msk.msra.mxu0 %vm4484_vm9, %v5132_v17  ;;  %vm4514_vm12 = vmpackc.low %vm170_vm6, %vm146_vm5  ;;  %vm194_vm0 = vcmp.eq.s32.totalorder %v5188_v9, %v5203_v13  ;;  %vm218_vm1 = vcmp.eq.s32.totalorder %v5191_v10, %v5203_v13  ;;  %vm240_vm3 = vcmp.eq.s32.totalorder %v5210_v15, %v5195_v11  ;;  %vm264_vm4 = vcmp.eq.s32.totalorder %v5213_v16, %v5195_v11 }
  0x1e   :  { %4515 = vmatprep.subr.msk.bf16.mxu1 %vm4514_vm12, %v5132_v17  ;;  %vm4486_vm15 = vmpackc.low %vm216_vm8, %vm192_vm7  ;;  %vm193_vm6 = vcmp.eq.s32.totalorder %v5188_v9, %v5207_v14  ;;  %vm217_vm7 = vcmp.eq.s32.totalorder %v5191_v10, %v5207_v14  ;;  %vm239_vm9 = vcmp.eq.s32.totalorder %v5210_v15, %v5199_v12  ;;  %vm242_vm12 = vcmp.eq.s32.totalorder %v5210_v15, %v5203_v13 }
  0x1f   :  { %4487 = vmatprep.subr.msk.bf16.mxu0 %vm4486_vm15, %v5132_v17  ;;  %vm4516_vm2 = vmpackc.low %vm169_vm11, %vm145_vm10  ;;  %vm263_vm10 = vcmp.eq.s32.totalorder %v5213_v16, %v5199_v12  ;;  %vm288_vm15 = vcmp.eq.s32.totalorder %v5252_v18, %v5195_v11  ;;  %v5281_v21 = vadd.s32 72, %v5165_v2  ;;  %v5304_v22 = vadd.s32 80, %v5165_v2 }
  0x20   :  { %4517 = vmatpush1.bf16.msk.msra.mxu1 %vm4516_vm2, %v5132_v17  ;;  %vm4488_vm5 = vmpackc.low %vm215_vm14, %vm191_vm13  ;;  %vm266_vm13 = vcmp.eq.s32.totalorder %v5213_v16, %v5203_v13  ;;  %vm241_vm2 = vcmp.eq.s32.totalorder %v5210_v15, %v5207_v14  ;;  %v5307_v23 = vadd.s32 88, %v5165_v2  ;;  %v5330_v24 = vadd.s32 96, %v5165_v2 }
  0x21   :  { %4489 = vmatpush1.bf16.msk.msra.mxu0 %vm4488_vm5, %v5132_v17  ;;  %vm4518_vm8 = vmpackc.low %vm218_vm1, %vm194_vm0  ;;  %vm312_vm0 = vcmp.eq.s32.totalorder %v5255_v19, %v5195_v11  ;;  %vm287_vm5 = vcmp.eq.s32.totalorder %v5252_v18, %v5199_v12  ;;  %v5333_v25 = vadd.s32 104, %v5165_v2  ;;  %v5356_v26 = vadd.s32 112, %v5165_v2 }
  0x22   :  { %4519 = vmatprep.subr.msk.bf16.mxu1 %vm4518_vm8, %v5132_v17  ;;  %vm4490_vm11 = vmpackc.low %vm264_vm4, %vm240_vm3  ;;  %vm265_vm3 = vcmp.eq.s32.totalorder %v5213_v16, %v5207_v14  ;;  %vm290_vm8 = vcmp.eq.s32.totalorder %v5252_v18, %v5203_v13  ;;  %v5359_v27 = vadd.s32 120, %v5165_v2  ;;  %v5367_v28 = vsub.s32 5, %v5165_v2 }
  0x23   :  { %4491 = vmatprep.subr.msk.bf16.mxu0 %vm4490_vm11, %v5132_v17  ;;  %vm4520_vm14 = vmpackc.low %vm217_vm7, %vm193_vm6  ;;  %vm311_vm6 = vcmp.eq.s32.totalorder %v5255_v19, %v5199_v12  ;;  %vm336_vm11 = vcmp.eq.s32.totalorder %v5278_v20, %v5195_v11  ;;  %v5375_v29 = vsub.s32 4, %v5165_v2  ;;  %v5386_v30 = vsub.s32 7, %v5165_v2 }
  0x24   :  { %4521 = vmatpush1.bf16.msk.msra.mxu1 %vm4520_vm14, %v5132_v17  ;;  %vm4492_vm1 = vmpackc.low %vm263_vm10, %vm239_vm9  ;;  %vm314_vm9 = vcmp.eq.s32.totalorder %v5255_v19, %v5203_v13  ;;  %vm289_vm14 = vcmp.eq.s32.totalorder %v5252_v18, %v5207_v14  ;;  %v5400_v31 = vrot.slane %v5185_v8, %v5367_v28  ;;  %v5403_v32 = vsub.s32 6, %v5165_v2 }
  0x25   :  { %4493 = vmatpush1.bf16.msk.msra.mxu0 %vm4492_vm1, %v5132_v17  ;;  %vm4522_vm4 = vmpackc.low %vm266_vm13, %vm242_vm12  ;;  %vm360_vm12 = vcmp.eq.s32.totalorder %v5281_v21, %v5195_v11  ;;  %vm335_vm1 = vcmp.eq.s32.totalorder %v5278_v20, %v5199_v12  ;;  %v5412_v33 = vrot.slane %v5185_v8, %v5375_v29  ;;  %v5421_v34 = vrot.slane %v5185_v8, %v5386_v30 }
  0x26   :  { %4523 = vmatprep.subr.msk.bf16.mxu1 %vm4522_vm4, %v5132_v17  ;;  %vm4494_vm7 = vmpackc.low %vm312_vm0, %vm288_vm15  ;;  %vm313_vm15 = vcmp.eq.s32.totalorder %v5255_v19, %v5207_v14  ;;  %vm338_vm4 = vcmp.eq.s32.totalorder %v5278_v20, %v5203_v13  ;;  %v5438_v35 = vrot.slane %v5185_v8, %v5403_v32  ;;  %v5605_v39 = vrot.slane %v5585_v38, %v5168_v3 }
  0x27   :  { %4495 = vmatprep.subr.msk.bf16.mxu0 %vm4494_vm7, %v5132_v17  ;;  %vm4524_vm10 = vmpackc.low %vm265_vm3, %vm241_vm2  ;;  %vm359_vm2 = vcmp.eq.s32.totalorder %v5281_v21, %v5199_v12  ;;  %vm384_vm7 = vcmp.eq.s32.totalorder %v5304_v22, %v5195_v11  ;;  %v5613_v40 = vrot.slane %v5585_v38, %v5171_v4  ;;  %v5623_v41 = vrot.slane %v5585_v38, %v5174_v5 }
  0x28   :  { %4525 = vmatpush1.bf16.msk.msra.mxu1 %vm4524_vm10, %v5132_v17  ;;  %vm4496_vm13 = vmpackc.low %vm311_vm6, %vm287_vm5  ;;  %vm362_vm5 = vcmp.eq.s32.totalorder %v5281_v21, %v5203_v13  ;;  %vm337_vm10 = vcmp.eq.s32.totalorder %v5278_v20, %v5207_v14  ;;  %v5637_v42 = vrot.slane %v5585_v38, %v5177_v6  ;;  %v5789_v43 = vrot.slane %v5585_v38, %v5367_v28 }
  0x29   :  { %4497 = vmatpush1.bf16.msk.msra.mxu0 %vm4496_vm13, %v5132_v17  ;;  %vm4526_vm0 = vmpackc.low %vm314_vm9, %vm290_vm8  ;;  %vm408_vm8 = vcmp.eq.s32.totalorder %v5307_v23, %v5195_v11  ;;  %vm383_vm13 = vcmp.eq.s32.totalorder %v5304_v22, %v5199_v12  ;;  %v5797_v44 = vrot.slane %v5585_v38, %v5375_v29  ;;  %v5807_v45 = vrot.slane %v5585_v38, %v5386_v30 }
  0x2a   :  { %4527 = vmatprep.subr.msk.bf16.mxu1 %vm4526_vm0, %v5132_v17  ;;  %vm4498_vm3 = vmpackc.low %vm360_vm12, %vm336_vm11  ;;  %vm361_vm11 = vcmp.eq.s32.totalorder %v5281_v21, %v5207_v14  ;;  %vm386_vm0 = vcmp.eq.s32.totalorder %v5304_v22, %v5203_v13  ;;  %v5821_v46 = vrot.slane %v5585_v38, %v5403_v32  ;;  %v5978_v48 = vrot.slane %v5958_v47, %v5168_v3 }
  0x2b   :  { %4499 = vmatprep.subr.msk.bf16.mxu0 %vm4498_vm3, %v5132_v17  ;;  %vm4528_vm6 = vmpackc.low %vm313_vm15, %vm289_vm14  ;;  %vm407_vm14 = vcmp.eq.s32.totalorder %v5307_v23, %v5199_v12  ;;  %vm432_vm3 = vcmp.eq.s32.totalorder %v5330_v24, %v5195_v11  ;;  %v5986_v49 = vrot.slane %v5958_v47, %v5171_v4  ;;  %v5996_v50 = vrot.slane %v5958_v47, %v5174_v5 }
  0x2c   :  { %4529 = vmatpush1.bf16.msk.msra.mxu1 %vm4528_vm6, %v5132_v17  ;;  %vm4500_vm9 = vmpackc.low %vm359_vm2, %vm335_vm1  ;;  %vm410_vm1 = vcmp.eq.s32.totalorder %v5307_v23, %v5203_v13  ;;  %vm385_vm6 = vcmp.eq.s32.totalorder %v5304_v22, %v5207_v14  ;;  %v6010_v51 = vrot.slane %v5958_v47, %v5177_v6  ;;  %v6162_v52 = vrot.slane %v5958_v47, %v5367_v28 }
  0x2d   :  { %4501 = vmatpush1.bf16.msk.msra.mxu0 %vm4500_vm9, %v5132_v17  ;;  %vm4530_vm12 = vmpackc.low %vm362_vm5, %vm338_vm4  ;;  %vm456_vm4 = vcmp.eq.s32.totalorder %v5333_v25, %v5195_v11  ;;  %vm431_vm9 = vcmp.eq.s32.totalorder %v5330_v24, %v5199_v12  ;;  %v6170_v53 = vrot.slane %v5958_v47, %v5375_v29  ;;  %v6180_v54 = vrot.slane %v5958_v47, %v5386_v30 }
  0x2e   :  { %4531 = vmatprep.subr.msk.bf16.mxu1 %vm4530_vm12, %v5132_v17  ;;  %vm4502_vm15 = vmpackc.low %vm408_vm8, %vm384_vm7  ;;  %vm409_vm7 = vcmp.eq.s32.totalorder %v5307_v23, %v5207_v14  ;;  %vm434_vm12 = vcmp.eq.s32.totalorder %v5330_v24, %v5203_v13  ;;  %v6194_v55 = vrot.slane %v5958_v47, %v5403_v32 }
  0x2f   :  { %4503 = vmatprep.subr.msk.bf16.mxu0 %vm4502_vm15, %v5132_v17  ;;  %vm4532_vm2 = vmpackc.low %vm361_vm11, %vm337_vm10  ;;  %vm455_vm10 = vcmp.eq.s32.totalorder %v5333_v25, %v5199_v12  ;;  %vm480_vm15 = vcmp.eq.s32.totalorder %v5356_v26, %v5195_v11 }
  0x30   :  { %4533 = vmatpush1.bf16.msk.msra.mxu1 %vm4532_vm2, %v5132_v17  ;;  %vm4504_vm5 = vmpackc.low %vm407_vm14, %vm383_vm13  ;;  %vm458_vm13 = vcmp.eq.s32.totalorder %v5333_v25, %v5203_v13  ;;  %vm433_vm2 = vcmp.eq.s32.totalorder %v5330_v24, %v5207_v14 }
  0x31   :  { %4505 = vmatpush1.bf16.msk.msra.mxu0 %vm4504_vm5, %v5132_v17  ;;  %vm4534_vm8 = vmpackc.low %vm410_vm1, %vm386_vm0  ;;  %vm504_vm0 = vcmp.eq.s32.totalorder %v5359_v27, %v5195_v11  ;;  %vm479_vm5 = vcmp.eq.s32.totalorder %v5356_v26, %v5199_v12 }
  0x32   :  { %4535 = vmatprep.subr.msk.bf16.mxu1 %vm4534_vm8, %v5132_v17  ;;  %vm4506_vm11 = vmpackc.low %vm456_vm4, %vm432_vm3  ;;  %vm457_vm3 = vcmp.eq.s32.totalorder %v5333_v25, %v5207_v14  ;;  %vm482_vm8 = vcmp.eq.s32.totalorder %v5356_v26, %v5203_v13 }
  0x33   :  { %4507 = vmatprep.subr.msk.bf16.mxu0 %vm4506_vm11, %v5132_v17  ;;  %vm4536_vm14 = vmpackc.low %vm409_vm7, %vm385_vm6  ;;  %vm503_vm6 = vcmp.eq.s32.totalorder %v5359_v27, %v5199_v12  ;;  %vm481_vm11 = vcmp.eq.s32.totalorder %v5356_v26, %v5207_v14 }
  0x34   :  { %4537 = vmatpush1.bf16.msk.msra.mxu1 %vm4536_vm14, %v5132_v17  ;;  %vm4508_vm1 = vmpackc.low %vm455_vm10, %vm431_vm9  ;;  %vm506_vm9 = vcmp.eq.s32.totalorder %v5359_v27, %v5203_v13  ;;  %vm148_vm14 = vcmp.eq.s32.totalorder %v5165_v2, %v5400_v31 }
  0x35   :  { %4509 = vmatpush1.bf16.msk.msra.mxu0 %vm4508_vm1, %v5132_v17  ;;  %vm4538_vm4 = vmpackc.low %vm458_vm13, %vm434_vm12  ;;  %vm505_vm12 = vcmp.eq.s32.totalorder %v5359_v27, %v5207_v14  ;;  %vm147_vm1 = vcmp.eq.s32.totalorder %v5165_v2, %v5412_v33 }
  0x36   :  { %4539 = vmatprep.subr.msk.bf16.mxu1 %vm4538_vm4, %v5132_v17  ;;  %vm4510_vm7 = vmpackc.low %vm504_vm0, %vm480_vm15  ;;  %vm172_vm15 = vcmp.eq.s32.totalorder %v5180_v7, %v5400_v31  ;;  %vm150_vm4 = vcmp.eq.s32.totalorder %v5165_v2, %v5421_v34 }
  0x37   :  { %4511 = vmatprep.subr.msk.bf16.mxu0 %vm4510_vm7, %v5132_v17  ;;  %vm4540_vm10 = vmpackc.low %vm457_vm3, %vm433_vm2  ;;  %vm171_vm2 = vcmp.eq.s32.totalorder %v5180_v7, %v5412_v33  ;;  %vm196_vm7 = vcmp.eq.s32.totalorder %v5188_v9, %v5400_v31 }
  0x38   :  { %4541 = vmatpush1.bf16.msk.msra.mxu1 %vm4540_vm10, %v5132_v17  ;;  %vm4512_vm13 = vmpackc.low %vm503_vm6, %vm479_vm5  ;;  %vm174_vm5 = vcmp.eq.s32.totalorder %v5180_v7, %v5421_v34  ;;  %vm149_vm10 = vcmp.eq.s32.totalorder %v5165_v2, %v5438_v35 }
  0x39   :  { %4513 = vmatpush1.bf16.msk.msra.mxu0 %vm4512_vm13, %v5132_v17  ;;  %vm4542_vm0 = vmpackc.low %vm506_vm9, %vm482_vm8  ;;  %vm220_vm8 = vcmp.eq.s32.totalorder %v5191_v10, %v5400_v31  ;;  %vm195_vm13 = vcmp.eq.s32.totalorder %v5188_v9, %v5412_v33 }
  0x3a   :  { %4543 = vmatprep.subr.msk.bf16.mxu1 %vm4542_vm0, %v5132_v17  ;;  %vm4544_vm3 = vmpackc.low %vm505_vm12, %vm481_vm11  ;;  %vm173_vm11 = vcmp.eq.s32.totalorder %v5180_v7, %v5438_v35  ;;  %vm198_vm0 = vcmp.eq.s32.totalorder %v5188_v9, %v5421_v34 }
  0x3b   :  { %vm4546_vm6 = vmpackc.low %vm172_vm15, %vm148_vm14  ;;  %vm219_vm14 = vcmp.eq.s32.totalorder %v5191_v10, %v5412_v33 }
  0x3c   :  { %1360 = vmatmul.mubr.f32.vlgmr.msra.gmra.mrb[0].mxu0 %v5441_v36  ;;  %4545 = vmatpush1.bf16.msk.msra.mxu1 %vm4544_vm3, %v5132_v17  ;;  %vm4548_vm9 = vmpackc.low %vm171_vm2, %vm147_vm1  ;;  %vm222_vm1 = vcmp.eq.s32.totalorder %v5191_v10, %v5421_v34  ;;  %vm244_vm3 = vcmp.eq.s32.totalorder %v5210_v15, %v5400_v31 }
  0x3d   :  { %4547 = vmatprep.subr.msk.bf16.mxu0 %vm4546_vm6, %v5132_v17  ;;  %1365 = vmatprep.mubr.f32.mxu0 %v5131_v1  ;;  %vm4578_vm12 = vmpackc.low %vm174_vm5, %vm150_vm4  ;;  %vm268_vm4 = vcmp.eq.s32.totalorder %v5213_v16, %v5400_v31  ;;  %vm197_vm6 = vcmp.eq.s32.totalorder %v5188_v9, %v5438_v35 }
  0x3e   :  { %4549 = vmatpush1.bf16.msk.msra.mxu0 %vm4548_vm9, %v5132_v17  ;;  %4579 = vmatprep.subr.msk.bf16.mxu1 %vm4578_vm12, %v5132_v17  ;;  %vm4550_vm15 = vmpackc.low %vm220_vm8, %vm196_vm7  ;;  %vm221_vm7 = vcmp.eq.s32.totalorder %v5191_v10, %v5438_v35  ;;  %vm243_vm9 = vcmp.eq.s32.totalorder %v5210_v15, %v5412_v33  ;;  %vm246_vm12 = vcmp.eq.s32.totalorder %v5210_v15, %v5421_v34 }
  0x3f   :  { %1437 = vmatmul.mubr.f32.vlgmr.msra.gmra.mrb[0].mxu1 %v5441_v36  ;;  %4551 = vmatprep.subr.msk.bf16.mxu0 %vm4550_vm15, %v5132_v17  ;;  %vm4580_vm2 = vmpackc.low %vm173_vm11, %vm149_vm10  ;;  %vm267_vm10 = vcmp.eq.s32.totalorder %v5213_v16, %v5412_v33  ;;  %vm292_vm15 = vcmp.eq.s32.totalorder %v5252_v18, %v5400_v31 }
  0x40   :  { %1366 = vmatmul.mubr.f32.gmra.mrb[2].mxu0 %v5464_v37  ;;  %4581 = vmatpush1.bf16.msk.msra.mxu1 %vm4580_vm2, %v5132_v17  ;;  %vm4552_vm5 = vmpackc.low %vm219_vm14, %vm195_vm13  ;;  %vm270_vm13 = vcmp.eq.s32.totalorder %v5213_v16, %v5421_v34  ;;  %vm245_vm2 = vcmp.eq.s32.totalorder %v5210_v15, %v5438_v35 }
  0x41   :  { %1442 = vmatprep.mubr.f32.mxu1 %v5131_v1  ;;  %vm4582_vm8 = vmpackc.low %vm222_vm1, %vm198_vm0  ;;  %1513 = vmatprep.mubr.f32.mxu0 %v5131_v1  ;;  %vm316_vm0 = vcmp.eq.s32.totalorder %v5255_v19, %v5400_v31 }
  0x42   :  { %4553 = vmatpush1.bf16.msk.msra.mxu0 %vm4552_vm5, %v5132_v17  ;;  %4583 = vmatprep.subr.msk.bf16.mxu1 %vm4582_vm8, %v5132_v17  ;;  %vm4554_vm11 = vmpackc.low %vm268_vm4, %vm244_vm3  ;;  %vm269_vm3 = vcmp.eq.s32.totalorder %v5213_v16, %v5438_v35  ;;  %vm291_vm5 = vcmp.eq.s32.totalorder %v5252_v18, %v5412_v33  ;;  %vm294_vm8 = vcmp.eq.s32.totalorder %v5252_v18, %v5421_v34 }
  0x43   :  { %1443 = vmatmul.mubr.f32.gmra.mrb[2].mxu1 %v5464_v37  ;;  %4555 = vmatprep.subr.msk.bf16.mxu0 %vm4554_vm11, %v5132_v17  ;;  %vm4584_vm14 = vmpackc.low %vm221_vm7, %vm197_vm6  ;;  %vm315_vm6 = vcmp.eq.s32.totalorder %v5255_v19, %v5412_v33  ;;  %vm340_vm11 = vcmp.eq.s32.totalorder %v5278_v20, %v5400_v31 }
  0x44   :  { %4585 = vmatpush1.bf16.msk.msra.mxu1 %vm4584_vm14, %v5132_v17  ;;  %vm4556_vm1 = vmpackc.low %vm267_vm10, %vm243_vm9  ;;  %1590 = vmatprep.mubr.f32.mxu1 %v5131_v1  ;;  %vm318_vm9 = vcmp.eq.s32.totalorder %v5255_v19, %v5421_v34  ;;  %vm293_vm14 = vcmp.eq.s32.totalorder %v5252_v18, %v5438_v35 }
  0x45   :  { %vm4586_vm4 = vmpackc.low %vm270_vm13, %vm246_vm12  ;;  %vm364_vm12 = vcmp.eq.s32.totalorder %v5281_v21, %v5400_v31 }
  0x46   :  { %4557 = vmatpush1.bf16.msk.msra.mxu0 %vm4556_vm1, %v5132_v17  ;;  %4587 = vmatprep.subr.msk.bf16.mxu1 %vm4586_vm4, %v5132_v17  ;;  %vm4558_vm7 = vmpackc.low %vm316_vm0, %vm292_vm15  ;;  %vm317_vm15 = vcmp.eq.s32.totalorder %v5255_v19, %v5438_v35  ;;  %vm339_vm1 = vcmp.eq.s32.totalorder %v5278_v20, %v5412_v33  ;;  %vm342_vm4 = vcmp.eq.s32.totalorder %v5278_v20, %v5421_v34 }
  0x47   :  { %4559 = vmatprep.subr.msk.bf16.mxu0 %vm4558_vm7, %v5132_v17  ;;  %vm4588_vm10 = vmpackc.low %vm269_vm3, %vm245_vm2  ;;  %vm363_vm2 = vcmp.eq.s32.totalorder %v5281_v21, %v5412_v33  ;;  %vm388_vm7 = vcmp.eq.s32.totalorder %v5304_v22, %v5400_v31 }
  0x48   :  { %4589 = vmatpush1.bf16.msk.msra.mxu1 %vm4588_vm10, %v5132_v17  ;;  %vm4560_vm13 = vmpackc.low %vm315_vm6, %vm291_vm5  ;;  %vm366_vm5 = vcmp.eq.s32.totalorder %v5281_v21, %v5421_v34  ;;  %vm341_vm10 = vcmp.eq.s32.totalorder %v5278_v20, %v5438_v35 }
  0x49   :  { %vm4590_vm0 = vmpackc.low %vm318_vm9, %vm294_vm8  ;;  %vm412_vm8 = vcmp.eq.s32.totalorder %v5307_v23, %v5400_v31 }
  0x4a   :  { %4561 = vmatpush1.bf16.msk.msra.mxu0 %vm4560_vm13, %v5132_v17  ;;  %4591 = vmatprep.subr.msk.bf16.mxu1 %vm4590_vm0, %v5132_v17  ;;  %vm4562_vm3 = vmpackc.low %vm364_vm12, %vm340_vm11  ;;  %vm365_vm11 = vcmp.eq.s32.totalorder %v5281_v21, %v5438_v35  ;;  %vm387_vm13 = vcmp.eq.s32.totalorder %v5304_v22, %v5412_v33  ;;  %vm390_vm0 = vcmp.eq.s32.totalorder %v5304_v22, %v5421_v34 }
  0x4b   :  { %4563 = vmatprep.subr.msk.bf16.mxu0 %vm4562_vm3, %v5132_v17  ;;  %vm4592_vm6 = vmpackc.low %vm317_vm15, %vm293_vm14  ;;  %vm411_vm14 = vcmp.eq.s32.totalorder %v5307_v23, %v5412_v33  ;;  %vm436_vm3 = vcmp.eq.s32.totalorder %v5330_v24, %v5400_v31 }
  0x4c   :  { %4593 = vmatpush1.bf16.msk.msra.mxu1 %vm4592_vm6, %v5132_v17  ;;  %vm4564_vm9 = vmpackc.low %vm363_vm2, %vm339_vm1  ;;  %vm414_vm1 = vcmp.eq.s32.totalorder %v5307_v23, %v5421_v34  ;;  %vm389_vm6 = vcmp.eq.s32.totalorder %v5304_v22, %v5438_v35 }
  0x4d   :  { %vm4594_vm12 = vmpackc.low %vm366_vm5, %vm342_vm4  ;;  %vm460_vm4 = vcmp.eq.s32.totalorder %v5333_v25, %v5400_v31 }
  0x4e   :  { %4565 = vmatpush1.bf16.msk.msra.mxu0 %vm4564_vm9, %v5132_v17  ;;  %4595 = vmatprep.subr.msk.bf16.mxu1 %vm4594_vm12, %v5132_v17  ;;  %vm4566_vm15 = vmpackc.low %vm412_vm8, %vm388_vm7  ;;  %vm413_vm7 = vcmp.eq.s32.totalorder %v5307_v23, %v5438_v35  ;;  %vm435_vm9 = vcmp.eq.s32.totalorder %v5330_v24, %v5412_v33  ;;  %vm438_vm12 = vcmp.eq.s32.totalorder %v5330_v24, %v5421_v34 }
  0x4f   :  { %4567 = vmatprep.subr.msk.bf16.mxu0 %vm4566_vm15, %v5132_v17  ;;  %vm4596_vm2 = vmpackc.low %vm365_vm11, %vm341_vm10  ;;  %vm459_vm10 = vcmp.eq.s32.totalorder %v5333_v25, %v5412_v33  ;;  %vm484_vm15 = vcmp.eq.s32.totalorder %v5356_v26, %v5400_v31 }
  0x50   :  { %4597 = vmatpush1.bf16.msk.msra.mxu1 %vm4596_vm2, %v5132_v17  ;;  %vm4568_vm5 = vmpackc.low %vm411_vm14, %vm387_vm13  ;;  %vm462_vm13 = vcmp.eq.s32.totalorder %v5333_v25, %v5421_v34  ;;  %vm437_vm2 = vcmp.eq.s32.totalorder %v5330_v24, %v5438_v35 }
  0x51   :  { %vm4598_vm8 = vmpackc.low %vm414_vm1, %vm390_vm0  ;;  %vm508_vm0 = vcmp.eq.s32.totalorder %v5359_v27, %v5400_v31 }
  0x52   :  { %4569 = vmatpush1.bf16.msk.msra.mxu0 %vm4568_vm5, %v5132_v17  ;;  %4599 = vmatprep.subr.msk.bf16.mxu1 %vm4598_vm8, %v5132_v17  ;;  %vm4570_vm11 = vmpackc.low %vm460_vm4, %vm436_vm3  ;;  %vm461_vm3 = vcmp.eq.s32.totalorder %v5333_v25, %v5438_v35  ;;  %vm483_vm5 = vcmp.eq.s32.totalorder %v5356_v26, %v5412_v33  ;;  %vm486_vm8 = vcmp.eq.s32.totalorder %v5356_v26, %v5421_v34 }
  0x53   :  { %4571 = vmatprep.subr.msk.bf16.mxu0 %vm4570_vm11, %v5132_v17  ;;  %vm4600_vm14 = vmpackc.low %vm413_vm7, %vm389_vm6  ;;  %vm507_vm6 = vcmp.eq.s32.totalorder %v5359_v27, %v5412_v33  ;;  %vm485_vm11 = vcmp.eq.s32.totalorder %v5356_v26, %v5438_v35 }
  0x54   :  { %4601 = vmatpush1.bf16.msk.msra.mxu1 %vm4600_vm14, %v5132_v17  ;;  %vm4572_vm1 = vmpackc.low %vm459_vm10, %vm435_vm9  ;;  %vm510_vm9 = vcmp.eq.s32.totalorder %v5359_v27, %v5421_v34  ;;  %vm152_vm14 = vcmp.eq.s32.totalorder %v5165_v2, %v5605_v39 }
  0x55   :  { %vm4602_vm4 = vmpackc.low %vm462_vm13, %vm438_vm12  ;;  %vm509_vm12 = vcmp.eq.s32.totalorder %v5359_v27, %v5438_v35 }
  0x56   :  { %4573 = vmatpush1.bf16.msk.msra.mxu0 %vm4572_vm1, %v5132_v17  ;;  %4603 = vmatprep.subr.msk.bf16.mxu1 %vm4602_vm4, %v5132_v17  ;;  %vm4574_vm7 = vmpackc.low %vm508_vm0, %vm484_vm15  ;;  %vm176_vm15 = vcmp.eq.s32.totalorder %v5180_v7, %v5605_v39  ;;  %vm151_vm1 = vcmp.eq.s32.totalorder %v5165_v2, %v5613_v40  ;;  %vm154_vm4 = vcmp.eq.s32.totalorder %v5165_v2, %v5623_v41 }
  0x57   :  { %4575 = vmatprep.subr.msk.bf16.mxu0 %vm4574_vm7, %v5132_v17  ;;  %vm4604_vm10 = vmpackc.low %vm461_vm3, %vm437_vm2  ;;  %vm175_vm2 = vcmp.eq.s32.totalorder %v5180_v7, %v5613_v40  ;;  %vm200_vm7 = vcmp.eq.s32.totalorder %v5188_v9, %v5605_v39 }
  0x58   :  { %4605 = vmatpush1.bf16.msk.msra.mxu1 %vm4604_vm10, %v5132_v17  ;;  %vm4576_vm13 = vmpackc.low %vm507_vm6, %vm483_vm5  ;;  %vm178_vm5 = vcmp.eq.s32.totalorder %v5180_v7, %v5623_v41  ;;  %vm153_vm10 = vcmp.eq.s32.totalorder %v5165_v2, %v5637_v42 }
  0x59   :  { %vm4606_vm0 = vmpackc.low %vm510_vm9, %vm486_vm8  ;;  %vm224_vm8 = vcmp.eq.s32.totalorder %v5191_v10, %v5605_v39 }
  0x5a   :  { %4577 = vmatpush1.bf16.msk.msra.mxu0 %vm4576_vm13, %v5132_v17  ;;  %4607 = vmatprep.subr.msk.bf16.mxu1 %vm4606_vm0, %v5132_v17  ;;  %vm4608_vm3 = vmpackc.low %vm509_vm12, %vm485_vm11  ;;  %vm177_vm11 = vcmp.eq.s32.totalorder %v5180_v7, %v5637_v42  ;;  %vm199_vm13 = vcmp.eq.s32.totalorder %v5188_v9, %v5613_v40  ;;  %vm202_vm0 = vcmp.eq.s32.totalorder %v5188_v9, %v5623_v41 }
  0x5b   :  { %vm4610_vm6 = vmpackc.low %vm176_vm15, %vm152_vm14  ;;  %vm223_vm14 = vcmp.eq.s32.totalorder %v5191_v10, %v5613_v40 }
  0x5c   :  { %4609 = vmatpush1.bf16.msk.msra.mxu1 %vm4608_vm3, %v5132_v17  ;;  %4611 = vmatprep.subr.msk.bf16.mxu0 %vm4610_vm6, %v5132_v17  ;;  %vm4612_vm9 = vmpackc.low %vm175_vm2, %vm151_vm1  ;;  %vm226_vm1 = vcmp.eq.s32.totalorder %v5191_v10, %v5623_v41  ;;  %vm248_vm3 = vcmp.eq.s32.totalorder %v5210_v15, %v5605_v39  ;;  %vm201_vm6 = vcmp.eq.s32.totalorder %v5188_v9, %v5637_v42 }
  0x5d   :  { %1514 = vmatmul.mubr.f32.vlgmr.msra.gmra.mrb[4].mxu0 %v5441_v36  ;;  %vm4642_vm12 = vmpackc.low %vm178_vm5, %vm154_vm4  ;;  %vm272_vm4 = vcmp.eq.s32.totalorder %v5213_v16, %v5605_v39 }
  0x5e   :  { %4613 = vmatpush1.bf16.msk.msra.mxu0 %vm4612_vm9, %v5132_v17  ;;  %1519 = vmatprep.mubr.f32.mxu0 %v5131_v1  ;;  %vm4614_vm15 = vmpackc.low %vm224_vm8, %vm200_vm7  ;;  %vm225_vm7 = vcmp.eq.s32.totalorder %v5191_v10, %v5637_v42  ;;  %vm247_vm9 = vcmp.eq.s32.totalorder %v5210_v15, %v5613_v40 }
  0x5f   :  { %4643 = vmatprep.subr.msk.bf16.mxu1 %vm4642_vm12, %v5132_v17  ;;  %1591 = vmatmul.mubr.f32.vlgmr.msra.gmra.mrb[4].mxu1 %v5441_v36  ;;  %vm4644_vm2 = vmpackc.low %vm177_vm11, %vm153_vm10  ;;  %vm271_vm10 = vcmp.eq.s32.totalorder %v5213_v16, %v5613_v40  ;;  %vm250_vm12 = vcmp.eq.s32.totalorder %v5210_v15, %v5623_v41 }
  0x60   :  { %4615 = vmatprep.subr.msk.bf16.mxu0 %vm4614_vm15, %v5132_v17  ;;  %4645 = vmatpush1.bf16.msk.msra.mxu1 %vm4644_vm2, %v5132_v17  ;;  %vm4616_vm5 = vmpackc.low %vm223_vm14, %vm199_vm13  ;;  %vm274_vm13 = vcmp.eq.s32.totalorder %v5213_v16, %v5623_v41  ;;  %vm296_vm15 = vcmp.eq.s32.totalorder %v5252_v18, %v5605_v39  ;;  %vm249_vm2 = vcmp.eq.s32.totalorder %v5210_v15, %v5637_v42 }
  0x61   :  { %1520 = vmatmul.mubr.f32.gmra.mrb[6].mxu0 %v5464_v37  ;;  %1596 = vmatprep.mubr.f32.mxu1 %v5131_v1  ;;  %vm4646_vm8 = vmpackc.low %vm226_vm1, %vm202_vm0  ;;  %vm320_vm0 = vcmp.eq.s32.totalorder %v5255_v19, %v5605_v39 }
  0x62   :  { %4617 = vmatpush1.bf16.msk.msra.mxu0 %vm4616_vm5, %v5132_v17  ;;  %4647 = vmatprep.subr.msk.bf16.mxu1 %vm4646_vm8, %v5132_v17  ;;  %vm4618_vm11 = vmpackc.low %vm272_vm4, %vm248_vm3  ;;  %vm273_vm3 = vcmp.eq.s32.totalorder %v5213_v16, %v5637_v42  ;;  %vm295_vm5 = vcmp.eq.s32.totalorder %v5252_v18, %v5613_v40  ;;  %vm298_vm8 = vcmp.eq.s32.totalorder %v5252_v18, %v5623_v41 }
  0x63   :  { %1597 = vmatmul.mubr.f32.gmra.mrb[6].mxu1 %v5464_v37  ;;  %4619 = vmatprep.subr.msk.bf16.mxu0 %vm4618_vm11, %v5132_v17  ;;  %vm4648_vm14 = vmpackc.low %vm225_vm7, %vm201_vm6  ;;  %vm319_vm6 = vcmp.eq.s32.totalorder %v5255_v19, %v5613_v40  ;;  %vm344_vm11 = vcmp.eq.s32.totalorder %v5278_v20, %v5605_v39 }
  0x64   :  { %4649 = vmatpush1.bf16.msk.msra.mxu1 %vm4648_vm14, %v5132_v17  ;;  %vm4620_vm1 = vmpackc.low %vm271_vm10, %vm247_vm9  ;;  %1667 = vmatprep.mubr.f32.mxu0 %v5131_v1  ;;  %vm322_vm9 = vcmp.eq.s32.totalorder %v5255_v19, %v5623_v41  ;;  %vm297_vm14 = vcmp.eq.s32.totalorder %v5252_v18, %v5637_v42 }
  0x65   :  { %vm4650_vm4 = vmpackc.low %vm274_vm13, %vm250_vm12  ;;  %1744 = vmatprep.mubr.f32.mxu1 %v5131_v1  ;;  %vm368_vm12 = vcmp.eq.s32.totalorder %v5281_v21, %v5605_v39 }
  0x66   :  { %4621 = vmatpush1.bf16.msk.msra.mxu0 %vm4620_vm1, %v5132_v17  ;;  %4651 = vmatprep.subr.msk.bf16.mxu1 %vm4650_vm4, %v5132_v17  ;;  %vm4622_vm7 = vmpackc.low %vm320_vm0, %vm296_vm15  ;;  %vm321_vm15 = vcmp.eq.s32.totalorder %v5255_v19, %v5637_v42  ;;  %vm343_vm1 = vcmp.eq.s32.totalorder %v5278_v20, %v5613_v40  ;;  %vm346_vm4 = vcmp.eq.s32.totalorder %v5278_v20, %v5623_v41 }
  0x67   :  { %4623 = vmatprep.subr.msk.bf16.mxu0 %vm4622_vm7, %v5132_v17  ;;  %vm4652_vm10 = vmpackc.low %vm273_vm3, %vm249_vm2  ;;  %vm367_vm2 = vcmp.eq.s32.totalorder %v5281_v21, %v5613_v40  ;;  %vm392_vm7 = vcmp.eq.s32.totalorder %v5304_v22, %v5605_v39 }
  0x68   :  { %4653 = vmatpush1.bf16.msk.msra.mxu1 %vm4652_vm10, %v5132_v17  ;;  %vm4624_vm13 = vmpackc.low %vm319_vm6, %vm295_vm5  ;;  %vm370_vm5 = vcmp.eq.s32.totalorder %v5281_v21, %v5623_v41  ;;  %vm345_vm10 = vcmp.eq.s32.totalorder %v5278_v20, %v5637_v42 }
  0x69   :  { %vm4654_vm0 = vmpackc.low %vm322_vm9, %vm298_vm8  ;;  %vm416_vm8 = vcmp.eq.s32.totalorder %v5307_v23, %v5605_v39 }
  0x6a   :  { %4625 = vmatpush1.bf16.msk.msra.mxu0 %vm4624_vm13, %v5132_v17  ;;  %4655 = vmatprep.subr.msk.bf16.mxu1 %vm4654_vm0, %v5132_v17  ;;  %vm4626_vm3 = vmpackc.low %vm368_vm12, %vm344_vm11  ;;  %vm369_vm11 = vcmp.eq.s32.totalorder %v5281_v21, %v5637_v42  ;;  %vm391_vm13 = vcmp.eq.s32.totalorder %v5304_v22, %v5613_v40  ;;  %vm394_vm0 = vcmp.eq.s32.totalorder %v5304_v22, %v5623_v41 }
  0x6b   :  { %4627 = vmatprep.subr.msk.bf16.mxu0 %vm4626_vm3, %v5132_v17  ;;  %vm4656_vm6 = vmpackc.low %vm321_vm15, %vm297_vm14  ;;  %vm415_vm14 = vcmp.eq.s32.totalorder %v5307_v23, %v5613_v40  ;;  %vm440_vm3 = vcmp.eq.s32.totalorder %v5330_v24, %v5605_v39 }
  0x6c   :  { %4657 = vmatpush1.bf16.msk.msra.mxu1 %vm4656_vm6, %v5132_v17  ;;  %vm4628_vm9 = vmpackc.low %vm367_vm2, %vm343_vm1  ;;  %vm418_vm1 = vcmp.eq.s32.totalorder %v5307_v23, %v5623_v41  ;;  %vm393_vm6 = vcmp.eq.s32.totalorder %v5304_v22, %v5637_v42 }
  0x6d   :  { %vm4658_vm12 = vmpackc.low %vm370_vm5, %vm346_vm4  ;;  %vm464_vm4 = vcmp.eq.s32.totalorder %v5333_v25, %v5605_v39 }
  0x6e   :  { %4629 = vmatpush1.bf16.msk.msra.mxu0 %vm4628_vm9, %v5132_v17  ;;  %4659 = vmatprep.subr.msk.bf16.mxu1 %vm4658_vm12, %v5132_v17  ;;  %vm4630_vm15 = vmpackc.low %vm416_vm8, %vm392_vm7  ;;  %vm417_vm7 = vcmp.eq.s32.totalorder %v5307_v23, %v5637_v42  ;;  %vm439_vm9 = vcmp.eq.s32.totalorder %v5330_v24, %v5613_v40  ;;  %vm442_vm12 = vcmp.eq.s32.totalorder %v5330_v24, %v5623_v41 }
  0x6f   :  { %4631 = vmatprep.subr.msk.bf16.mxu0 %vm4630_vm15, %v5132_v17  ;;  %vm4660_vm2 = vmpackc.low %vm369_vm11, %vm345_vm10  ;;  %vm463_vm10 = vcmp.eq.s32.totalorder %v5333_v25, %v5613_v40  ;;  %vm488_vm15 = vcmp.eq.s32.totalorder %v5356_v26, %v5605_v39 }
  0x70   :  { %4661 = vmatpush1.bf16.msk.msra.mxu1 %vm4660_vm2, %v5132_v17  ;;  %vm4632_vm5 = vmpackc.low %vm415_vm14, %vm391_vm13  ;;  %vm466_vm13 = vcmp.eq.s32.totalorder %v5333_v25, %v5623_v41  ;;  %vm441_vm2 = vcmp.eq.s32.totalorder %v5330_v24, %v5637_v42 }
  0x71   :  { %vm4662_vm8 = vmpackc.low %vm418_vm1, %vm394_vm0  ;;  %vm512_vm0 = vcmp.eq.s32.totalorder %v5359_v27, %v5605_v39 }
  0x72   :  { %4633 = vmatpush1.bf16.msk.msra.mxu0 %vm4632_vm5, %v5132_v17  ;;  %4663 = vmatprep.subr.msk.bf16.mxu1 %vm4662_vm8, %v5132_v17  ;;  %vm4634_vm11 = vmpackc.low %vm464_vm4, %vm440_vm3  ;;  %vm465_vm3 = vcmp.eq.s32.totalorder %v5333_v25, %v5637_v42  ;;  %vm487_vm5 = vcmp.eq.s32.totalorder %v5356_v26, %v5613_v40  ;;  %vm490_vm8 = vcmp.eq.s32.totalorder %v5356_v26, %v5623_v41 }
  0x73   :  { %4635 = vmatprep.subr.msk.bf16.mxu0 %vm4634_vm11, %v5132_v17  ;;  %vm4664_vm14 = vmpackc.low %vm417_vm7, %vm393_vm6  ;;  %vm511_vm6 = vcmp.eq.s32.totalorder %v5359_v27, %v5613_v40  ;;  %vm489_vm11 = vcmp.eq.s32.totalorder %v5356_v26, %v5637_v42 }
  0x74   :  { %4665 = vmatpush1.bf16.msk.msra.mxu1 %vm4664_vm14, %v5132_v17  ;;  %vm4636_vm1 = vmpackc.low %vm463_vm10, %vm439_vm9  ;;  %vm514_vm9 = vcmp.eq.s32.totalorder %v5359_v27, %v5623_v41  ;;  %vm156_vm14 = vcmp.eq.s32.totalorder %v5165_v2, %v5789_v43 }
  0x75   :  { %vm4666_vm4 = vmpackc.low %vm466_vm13, %vm442_vm12  ;;  %vm513_vm12 = vcmp.eq.s32.totalorder %v5359_v27, %v5637_v42 }
  0x76   :  { %4637 = vmatpush1.bf16.msk.msra.mxu0 %vm4636_vm1, %v5132_v17  ;;  %4667 = vmatprep.subr.msk.bf16.mxu1 %vm4666_vm4, %v5132_v17  ;;  %vm4638_vm7 = vmpackc.low %vm512_vm0, %vm488_vm15  ;;  %vm180_vm15 = vcmp.eq.s32.totalorder %v5180_v7, %v5789_v43  ;;  %vm155_vm1 = vcmp.eq.s32.totalorder %v5165_v2, %v5797_v44  ;;  %vm158_vm4 = vcmp.eq.s32.totalorder %v5165_v2, %v5807_v45 }
  0x77   :  { %4639 = vmatprep.subr.msk.bf16.mxu0 %vm4638_vm7, %v5132_v17  ;;  %vm4668_vm10 = vmpackc.low %vm465_vm3, %vm441_vm2  ;;  %vm179_vm2 = vcmp.eq.s32.totalorder %v5180_v7, %v5797_v44  ;;  %vm204_vm7 = vcmp.eq.s32.totalorder %v5188_v9, %v5789_v43 }
  0x78   :  { %4669 = vmatpush1.bf16.msk.msra.mxu1 %vm4668_vm10, %v5132_v17  ;;  %vm4640_vm13 = vmpackc.low %vm511_vm6, %vm487_vm5  ;;  %vm182_vm5 = vcmp.eq.s32.totalorder %v5180_v7, %v5807_v45  ;;  %vm157_vm10 = vcmp.eq.s32.totalorder %v5165_v2, %v5821_v46 }
  0x79   :  { %vm4670_vm0 = vmpackc.low %vm514_vm9, %vm490_vm8  ;;  %vm228_vm8 = vcmp.eq.s32.totalorder %v5191_v10, %v5789_v43 }
  0x7a   :  { %4641 = vmatpush1.bf16.msk.msra.mxu0 %vm4640_vm13, %v5132_v17  ;;  %4671 = vmatprep.subr.msk.bf16.mxu1 %vm4670_vm0, %v5132_v17  ;;  %vm4672_vm3 = vmpackc.low %vm513_vm12, %vm489_vm11  ;;  %vm181_vm11 = vcmp.eq.s32.totalorder %v5180_v7, %v5821_v46  ;;  %vm203_vm13 = vcmp.eq.s32.totalorder %v5188_v9, %v5797_v44  ;;  %vm206_vm0 = vcmp.eq.s32.totalorder %v5188_v9, %v5807_v45 }
  0x7b   :  { %vm4674_vm6 = vmpackc.low %vm180_vm15, %vm156_vm14  ;;  %vm227_vm14 = vcmp.eq.s32.totalorder %v5191_v10, %v5797_v44 }
  0x7c   :  { %4673 = vmatpush1.bf16.msk.msra.mxu1 %vm4672_vm3, %v5132_v17  ;;  %4675 = vmatprep.subr.msk.bf16.mxu0 %vm4674_vm6, %v5132_v17  ;;  %vm4676_vm9 = vmpackc.low %vm179_vm2, %vm155_vm1  ;;  %vm230_vm1 = vcmp.eq.s32.totalorder %v5191_v10, %v5807_v45  ;;  %vm252_vm3 = vcmp.eq.s32.totalorder %v5210_v15, %v5789_v43  ;;  %vm205_vm6 = vcmp.eq.s32.totalorder %v5188_v9, %v5821_v46 }
  0x7d   :  { %1668 = vmatmul.mubr.f32.vlgmr.msra.gmra.mrb[8].mxu0 %v5441_v36  ;;  %vm4706_vm12 = vmpackc.low %vm182_vm5, %vm158_vm4  ;;  %vm276_vm4 = vcmp.eq.s32.totalorder %v5213_v16, %v5789_v43 }
  0x7e   :  { %4677 = vmatpush1.bf16.msk.msra.mxu0 %vm4676_vm9, %v5132_v17  ;;  %1673 = vmatprep.mubr.f32.mxu0 %v5131_v1  ;;  %vm4678_vm15 = vmpackc.low %vm228_vm8, %vm204_vm7  ;;  %vm229_vm7 = vcmp.eq.s32.totalorder %v5191_v10, %v5821_v46  ;;  %vm251_vm9 = vcmp.eq.s32.totalorder %v5210_v15, %v5797_v44 }
  0x7f   :  { %4707 = vmatprep.subr.msk.bf16.mxu1 %vm4706_vm12, %v5132_v17  ;;  %1745 = vmatmul.mubr.f32.vlgmr.msra.gmra.mrb[8].mxu1 %v5441_v36  ;;  %vm4708_vm2 = vmpackc.low %vm181_vm11, %vm157_vm10  ;;  %vm275_vm10 = vcmp.eq.s32.totalorder %v5213_v16, %v5797_v44  ;;  %vm254_vm12 = vcmp.eq.s32.totalorder %v5210_v15, %v5807_v45 }
  0x80   :  { %4679 = vmatprep.subr.msk.bf16.mxu0 %vm4678_vm15, %v5132_v17  ;;  %4709 = vmatpush1.bf16.msk.msra.mxu1 %vm4708_vm2, %v5132_v17  ;;  %vm4680_vm5 = vmpackc.low %vm227_vm14, %vm203_vm13  ;;  %vm278_vm13 = vcmp.eq.s32.totalorder %v5213_v16, %v5807_v45  ;;  %vm300_vm15 = vcmp.eq.s32.totalorder %v5252_v18, %v5789_v43  ;;  %vm253_vm2 = vcmp.eq.s32.totalorder %v5210_v15, %v5821_v46 }
  0x81   :  { %1674 = vmatmul.mubr.f32.gmra.mrb[10].mxu0 %v5464_v37  ;;  %1750 = vmatprep.mubr.f32.mxu1 %v5131_v1  ;;  %vm4710_vm8 = vmpackc.low %vm230_vm1, %vm206_vm0  ;;  %vm324_vm0 = vcmp.eq.s32.totalorder %v5255_v19, %v5789_v43 }
  0x82   :  { %4681 = vmatpush1.bf16.msk.msra.mxu0 %vm4680_vm5, %v5132_v17  ;;  %4711 = vmatprep.subr.msk.bf16.mxu1 %vm4710_vm8, %v5132_v17  ;;  %vm4682_vm11 = vmpackc.low %vm276_vm4, %vm252_vm3  ;;  %vm277_vm3 = vcmp.eq.s32.totalorder %v5213_v16, %v5821_v46  ;;  %vm299_vm5 = vcmp.eq.s32.totalorder %v5252_v18, %v5797_v44  ;;  %vm302_vm8 = vcmp.eq.s32.totalorder %v5252_v18, %v5807_v45 }
  0x83   :  { %1751 = vmatmul.mubr.f32.gmra.mrb[10].mxu1 %v5464_v37  ;;  %4683 = vmatprep.subr.msk.bf16.mxu0 %vm4682_vm11, %v5132_v17  ;;  %vm4712_vm14 = vmpackc.low %vm229_vm7, %vm205_vm6  ;;  %vm323_vm6 = vcmp.eq.s32.totalorder %v5255_v19, %v5797_v44  ;;  %vm348_vm11 = vcmp.eq.s32.totalorder %v5278_v20, %v5789_v43 }
  0x84   :  { %4713 = vmatpush1.bf16.msk.msra.mxu1 %vm4712_vm14, %v5132_v17  ;;  %vm4684_vm1 = vmpackc.low %vm275_vm10, %vm251_vm9  ;;  %1821 = vmatprep.mubr.f32.mxu0 %v5131_v1  ;;  %vm326_vm9 = vcmp.eq.s32.totalorder %v5255_v19, %v5807_v45  ;;  %vm301_vm14 = vcmp.eq.s32.totalorder %v5252_v18, %v5821_v46 }
  0x85   :  { %vm4714_vm4 = vmpackc.low %vm278_vm13, %vm254_vm12  ;;  %1898 = vmatprep.mubr.f32.mxu1 %v5131_v1  ;;  %vm372_vm12 = vcmp.eq.s32.totalorder %v5281_v21, %v5789_v43 }
  0x86   :  { %4685 = vmatpush1.bf16.msk.msra.mxu0 %vm4684_vm1, %v5132_v17  ;;  %4715 = vmatprep.subr.msk.bf16.mxu1 %vm4714_vm4, %v5132_v17  ;;  %vm4686_vm7 = vmpackc.low %vm324_vm0, %vm300_vm15  ;;  %vm325_vm15 = vcmp.eq.s32.totalorder %v5255_v19, %v5821_v46  ;;  %vm347_vm1 = vcmp.eq.s32.totalorder %v5278_v20, %v5797_v44  ;;  %vm350_vm4 = vcmp.eq.s32.totalorder %v5278_v20, %v5807_v45 }
  0x87   :  { %4687 = vmatprep.subr.msk.bf16.mxu0 %vm4686_vm7, %v5132_v17  ;;  %vm4716_vm10 = vmpackc.low %vm277_vm3, %vm253_vm2  ;;  %vm371_vm2 = vcmp.eq.s32.totalorder %v5281_v21, %v5797_v44  ;;  %vm396_vm7 = vcmp.eq.s32.totalorder %v5304_v22, %v5789_v43 }
  0x88   :  { %4717 = vmatpush1.bf16.msk.msra.mxu1 %vm4716_vm10, %v5132_v17  ;;  %vm4688_vm13 = vmpackc.low %vm323_vm6, %vm299_vm5  ;;  %vm374_vm5 = vcmp.eq.s32.totalorder %v5281_v21, %v5807_v45  ;;  %vm349_vm10 = vcmp.eq.s32.totalorder %v5278_v20, %v5821_v46 }
  0x89   :  { %vm4718_vm0 = vmpackc.low %vm326_vm9, %vm302_vm8  ;;  %vm420_vm8 = vcmp.eq.s32.totalorder %v5307_v23, %v5789_v43 }
  0x8a   :  { %4689 = vmatpush1.bf16.msk.msra.mxu0 %vm4688_vm13, %v5132_v17  ;;  %4719 = vmatprep.subr.msk.bf16.mxu1 %vm4718_vm0, %v5132_v17  ;;  %vm4690_vm3 = vmpackc.low %vm372_vm12, %vm348_vm11  ;;  %vm373_vm11 = vcmp.eq.s32.totalorder %v5281_v21, %v5821_v46  ;;  %vm395_vm13 = vcmp.eq.s32.totalorder %v5304_v22, %v5797_v44  ;;  %vm398_vm0 = vcmp.eq.s32.totalorder %v5304_v22, %v5807_v45 }
  0x8b   :  { %4691 = vmatprep.subr.msk.bf16.mxu0 %vm4690_vm3, %v5132_v17  ;;  %vm4720_vm6 = vmpackc.low %vm325_vm15, %vm301_vm14  ;;  %vm419_vm14 = vcmp.eq.s32.totalorder %v5307_v23, %v5797_v44  ;;  %vm444_vm3 = vcmp.eq.s32.totalorder %v5330_v24, %v5789_v43 }
  0x8c   :  { %4721 = vmatpush1.bf16.msk.msra.mxu1 %vm4720_vm6, %v5132_v17  ;;  %vm4692_vm9 = vmpackc.low %vm371_vm2, %vm347_vm1  ;;  %vm422_vm1 = vcmp.eq.s32.totalorder %v5307_v23, %v5807_v45  ;;  %vm397_vm6 = vcmp.eq.s32.totalorder %v5304_v22, %v5821_v46 }
  0x8d   :  { %vm4722_vm12 = vmpackc.low %vm374_vm5, %vm350_vm4  ;;  %vm468_vm4 = vcmp.eq.s32.totalorder %v5333_v25, %v5789_v43 }
  0x8e   :  { %4693 = vmatpush1.bf16.msk.msra.mxu0 %vm4692_vm9, %v5132_v17  ;;  %4723 = vmatprep.subr.msk.bf16.mxu1 %vm4722_vm12, %v5132_v17  ;;  %vm4694_vm15 = vmpackc.low %vm420_vm8, %vm396_vm7  ;;  %vm421_vm7 = vcmp.eq.s32.totalorder %v5307_v23, %v5821_v46  ;;  %vm443_vm9 = vcmp.eq.s32.totalorder %v5330_v24, %v5797_v44  ;;  %vm446_vm12 = vcmp.eq.s32.totalorder %v5330_v24, %v5807_v45 }
  0x8f   :  { %4695 = vmatprep.subr.msk.bf16.mxu0 %vm4694_vm15, %v5132_v17  ;;  %vm4724_vm2 = vmpackc.low %vm373_vm11, %vm349_vm10  ;;  %vm467_vm10 = vcmp.eq.s32.totalorder %v5333_v25, %v5797_v44  ;;  %vm492_vm15 = vcmp.eq.s32.totalorder %v5356_v26, %v5789_v43 }
  0x90   :  { %4725 = vmatpush1.bf16.msk.msra.mxu1 %vm4724_vm2, %v5132_v17  ;;  %vm4696_vm5 = vmpackc.low %vm419_vm14, %vm395_vm13  ;;  %vm470_vm13 = vcmp.eq.s32.totalorder %v5333_v25, %v5807_v45  ;;  %vm445_vm2 = vcmp.eq.s32.totalorder %v5330_v24, %v5821_v46 }
  0x91   :  { %vm4726_vm8 = vmpackc.low %vm422_vm1, %vm398_vm0  ;;  %vm516_vm0 = vcmp.eq.s32.totalorder %v5359_v27, %v5789_v43 }
  0x92   :  { %4697 = vmatpush1.bf16.msk.msra.mxu0 %vm4696_vm5, %v5132_v17  ;;  %4727 = vmatprep.subr.msk.bf16.mxu1 %vm4726_vm8, %v5132_v17  ;;  %vm4698_vm11 = vmpackc.low %vm468_vm4, %vm444_vm3  ;;  %vm469_vm3 = vcmp.eq.s32.totalorder %v5333_v25, %v5821_v46  ;;  %vm491_vm5 = vcmp.eq.s32.totalorder %v5356_v26, %v5797_v44  ;;  %vm494_vm8 = vcmp.eq.s32.totalorder %v5356_v26, %v5807_v45 }
  0x93   :  { %4699 = vmatprep.subr.msk.bf16.mxu0 %vm4698_vm11, %v5132_v17  ;;  %vm4728_vm14 = vmpackc.low %vm421_vm7, %vm397_vm6  ;;  %vm515_vm6 = vcmp.eq.s32.totalorder %v5359_v27, %v5797_v44  ;;  %vm493_vm11 = vcmp.eq.s32.totalorder %v5356_v26, %v5821_v46 }
  0x94   :  { %4729 = vmatpush1.bf16.msk.msra.mxu1 %vm4728_vm14, %v5132_v17  ;;  %vm4700_vm1 = vmpackc.low %vm467_vm10, %vm443_vm9  ;;  %vm518_vm9 = vcmp.eq.s32.totalorder %v5359_v27, %v5807_v45  ;;  %vm160_vm14 = vcmp.eq.s32.totalorder %v5165_v2, %v5978_v48 }
  0x95   :  { %vm4730_vm4 = vmpackc.low %vm470_vm13, %vm446_vm12  ;;  %vm517_vm12 = vcmp.eq.s32.totalorder %v5359_v27, %v5821_v46 }
  0x96   :  { %4701 = vmatpush1.bf16.msk.msra.mxu0 %vm4700_vm1, %v5132_v17  ;;  %4731 = vmatprep.subr.msk.bf16.mxu1 %vm4730_vm4, %v5132_v17  ;;  %vm4702_vm7 = vmpackc.low %vm516_vm0, %vm492_vm15  ;;  %vm184_vm15 = vcmp.eq.s32.totalorder %v5180_v7, %v5978_v48  ;;  %vm159_vm1 = vcmp.eq.s32.totalorder %v5165_v2, %v5986_v49  ;;  %vm162_vm4 = vcmp.eq.s32.totalorder %v5165_v2, %v5996_v50 }
  0x97   :  { %4703 = vmatprep.subr.msk.bf16.mxu0 %vm4702_vm7, %v5132_v17  ;;  %vm4732_vm10 = vmpackc.low %vm469_vm3, %vm445_vm2  ;;  %vm183_vm2 = vcmp.eq.s32.totalorder %v5180_v7, %v5986_v49  ;;  %vm208_vm7 = vcmp.eq.s32.totalorder %v5188_v9, %v5978_v48 }
  0x98   :  { %4733 = vmatpush1.bf16.msk.msra.mxu1 %vm4732_vm10, %v5132_v17  ;;  %vm4704_vm13 = vmpackc.low %vm515_vm6, %vm491_vm5  ;;  %vm186_vm5 = vcmp.eq.s32.totalorder %v5180_v7, %v5996_v50  ;;  %vm161_vm10 = vcmp.eq.s32.totalorder %v5165_v2, %v6010_v51 }
  0x99   :  { %vm4734_vm0 = vmpackc.low %vm518_vm9, %vm494_vm8  ;;  %vm232_vm8 = vcmp.eq.s32.totalorder %v5191_v10, %v5978_v48 }
  0x9a   :  { %4705 = vmatpush1.bf16.msk.msra.mxu0 %vm4704_vm13, %v5132_v17  ;;  %4735 = vmatprep.subr.msk.bf16.mxu1 %vm4734_vm0, %v5132_v17  ;;  %vm4736_vm3 = vmpackc.low %vm517_vm12, %vm493_vm11  ;;  %vm185_vm11 = vcmp.eq.s32.totalorder %v5180_v7, %v6010_v51  ;;  %vm207_vm13 = vcmp.eq.s32.totalorder %v5188_v9, %v5986_v49  ;;  %vm210_vm0 = vcmp.eq.s32.totalorder %v5188_v9, %v5996_v50 }
  0x9b   :  { %vm4738_vm6 = vmpackc.low %vm184_vm15, %vm160_vm14  ;;  %vm231_vm14 = vcmp.eq.s32.totalorder %v5191_v10, %v5986_v49 }
  0x9c   :  { %4737 = vmatpush1.bf16.msk.msra.mxu1 %vm4736_vm3, %v5132_v17  ;;  %4739 = vmatprep.subr.msk.bf16.mxu0 %vm4738_vm6, %v5132_v17  ;;  %vm4740_vm9 = vmpackc.low %vm183_vm2, %vm159_vm1  ;;  %vm234_vm1 = vcmp.eq.s32.totalorder %v5191_v10, %v5996_v50  ;;  %vm256_vm3 = vcmp.eq.s32.totalorder %v5210_v15, %v5978_v48  ;;  %vm209_vm6 = vcmp.eq.s32.totalorder %v5188_v9, %v6010_v51 }
  0x9d   :  { %1822 = vmatmul.mubr.f32.vlgmr.msra.gmra.mrb[12].mxu0 %v5441_v36  ;;  %vm4770_vm12 = vmpackc.low %vm186_vm5, %vm162_vm4  ;;  %vm280_vm4 = vcmp.eq.s32.totalorder %v5213_v16, %v5978_v48 }
  0x9e   :  { %4741 = vmatpush1.bf16.msk.msra.mxu0 %vm4740_vm9, %v5132_v17  ;;  %1827 = vmatprep.mubr.f32.mxu0 %v5131_v1  ;;  %vm4742_vm15 = vmpackc.low %vm232_vm8, %vm208_vm7  ;;  %vm233_vm7 = vcmp.eq.s32.totalorder %v5191_v10, %v6010_v51  ;;  %vm255_vm9 = vcmp.eq.s32.totalorder %v5210_v15, %v5986_v49 }
  0x9f   :  { %4771 = vmatprep.subr.msk.bf16.mxu1 %vm4770_vm12, %v5132_v17  ;;  %1899 = vmatmul.mubr.f32.vlgmr.msra.gmra.mrb[12].mxu1 %v5441_v36  ;;  %vm4772_vm2 = vmpackc.low %vm185_vm11, %vm161_vm10  ;;  %vm279_vm10 = vcmp.eq.s32.totalorder %v5213_v16, %v5986_v49  ;;  %vm258_vm12 = vcmp.eq.s32.totalorder %v5210_v15, %v5996_v50 }
  0xa0   :  { %4743 = vmatprep.subr.msk.bf16.mxu0 %vm4742_vm15, %v5132_v17  ;;  %4773 = vmatpush1.bf16.msk.msra.mxu1 %vm4772_vm2, %v5132_v17  ;;  %vm4744_vm5 = vmpackc.low %vm231_vm14, %vm207_vm13  ;;  %vm282_vm13 = vcmp.eq.s32.totalorder %v5213_v16, %v5996_v50  ;;  %vm304_vm15 = vcmp.eq.s32.totalorder %v5252_v18, %v5978_v48  ;;  %vm257_vm2 = vcmp.eq.s32.totalorder %v5210_v15, %v6010_v51 }
  0xa1   :  { %1828 = vmatmul.mubr.f32.gmra.mrb[14].mxu0 %v5464_v37  ;;  %1904 = vmatprep.mubr.f32.mxu1 %v5131_v1  ;;  %vm4774_vm8 = vmpackc.low %vm234_vm1, %vm210_vm0  ;;  %vm328_vm0 = vcmp.eq.s32.totalorder %v5255_v19, %v5978_v48 }
  0xa2   :  { %4745 = vmatpush1.bf16.msk.msra.mxu0 %vm4744_vm5, %v5132_v17  ;;  %4775 = vmatprep.subr.msk.bf16.mxu1 %vm4774_vm8, %v5132_v17  ;;  %vm4746_vm11 = vmpackc.low %vm280_vm4, %vm256_vm3  ;;  %vm281_vm3 = vcmp.eq.s32.totalorder %v5213_v16, %v6010_v51  ;;  %vm303_vm5 = vcmp.eq.s32.totalorder %v5252_v18, %v5986_v49  ;;  %vm306_vm8 = vcmp.eq.s32.totalorder %v5252_v18, %v5996_v50 }
  0xa3   :  { %1905 = vmatmul.mubr.f32.gmra.mrb[14].mxu1 %v5464_v37  ;;  %4747 = vmatprep.subr.msk.bf16.mxu0 %vm4746_vm11, %v5132_v17  ;;  %vm4776_vm14 = vmpackc.low %vm233_vm7, %vm209_vm6  ;;  %vm327_vm6 = vcmp.eq.s32.totalorder %v5255_v19, %v5986_v49  ;;  %vm352_vm11 = vcmp.eq.s32.totalorder %v5278_v20, %v5978_v48 }
  0xa4   :  { %4777 = vmatpush1.bf16.msk.msra.mxu1 %vm4776_vm14, %v5132_v17  ;;  %vm4748_vm1 = vmpackc.low %vm279_vm10, %vm255_vm9  ;;  %1975 = vmatprep.mubr.f32.mxu0 %v5131_v1  ;;  %vm330_vm9 = vcmp.eq.s32.totalorder %v5255_v19, %v5996_v50  ;;  %vm305_vm14 = vcmp.eq.s32.totalorder %v5252_v18, %v6010_v51 }
  0xa5   :  { %vm4778_vm4 = vmpackc.low %vm282_vm13, %vm258_vm12  ;;  %2052 = vmatprep.mubr.f32.mxu1 %v5131_v1  ;;  %vm376_vm12 = vcmp.eq.s32.totalorder %v5281_v21, %v5978_v48 }
  0xa6   :  { %4749 = vmatpush1.bf16.msk.msra.mxu0 %vm4748_vm1, %v5132_v17  ;;  %4779 = vmatprep.subr.msk.bf16.mxu1 %vm4778_vm4, %v5132_v17  ;;  %vm4750_vm7 = vmpackc.low %vm328_vm0, %vm304_vm15  ;;  %vm329_vm15 = vcmp.eq.s32.totalorder %v5255_v19, %v6010_v51  ;;  %vm351_vm1 = vcmp.eq.s32.totalorder %v5278_v20, %v5986_v49  ;;  %vm354_vm4 = vcmp.eq.s32.totalorder %v5278_v20, %v5996_v50 }
  0xa7   :  { %4751 = vmatprep.subr.msk.bf16.mxu0 %vm4750_vm7, %v5132_v17  ;;  %vm4780_vm10 = vmpackc.low %vm281_vm3, %vm257_vm2  ;;  %vm375_vm2 = vcmp.eq.s32.totalorder %v5281_v21, %v5986_v49  ;;  %vm400_vm7 = vcmp.eq.s32.totalorder %v5304_v22, %v5978_v48 }
  0xa8   :  { %4781 = vmatpush1.bf16.msk.msra.mxu1 %vm4780_vm10, %v5132_v17  ;;  %vm4752_vm13 = vmpackc.low %vm327_vm6, %vm303_vm5  ;;  %vm378_vm5 = vcmp.eq.s32.totalorder %v5281_v21, %v5996_v50  ;;  %vm353_vm10 = vcmp.eq.s32.totalorder %v5278_v20, %v6010_v51 }
  0xa9   :  { %vm4782_vm0 = vmpackc.low %vm330_vm9, %vm306_vm8  ;;  %vm424_vm8 = vcmp.eq.s32.totalorder %v5307_v23, %v5978_v48 }
  0xaa   :  { %4753 = vmatpush1.bf16.msk.msra.mxu0 %vm4752_vm13, %v5132_v17  ;;  %4783 = vmatprep.subr.msk.bf16.mxu1 %vm4782_vm0, %v5132_v17  ;;  %vm4754_vm3 = vmpackc.low %vm376_vm12, %vm352_vm11  ;;  %vm377_vm11 = vcmp.eq.s32.totalorder %v5281_v21, %v6010_v51  ;;  %vm399_vm13 = vcmp.eq.s32.totalorder %v5304_v22, %v5986_v49  ;;  %vm402_vm0 = vcmp.eq.s32.totalorder %v5304_v22, %v5996_v50 }
  0xab   :  { %4755 = vmatprep.subr.msk.bf16.mxu0 %vm4754_vm3, %v5132_v17  ;;  %vm4784_vm6 = vmpackc.low %vm329_vm15, %vm305_vm14  ;;  %vm423_vm14 = vcmp.eq.s32.totalorder %v5307_v23, %v5986_v49  ;;  %vm448_vm3 = vcmp.eq.s32.totalorder %v5330_v24, %v5978_v48 }
  0xac   :  { %4785 = vmatpush1.bf16.msk.msra.mxu1 %vm4784_vm6, %v5132_v17  ;;  %vm4756_vm9 = vmpackc.low %vm375_vm2, %vm351_vm1  ;;  %vm426_vm1 = vcmp.eq.s32.totalorder %v5307_v23, %v5996_v50  ;;  %vm401_vm6 = vcmp.eq.s32.totalorder %v5304_v22, %v6010_v51 }
  0xad   :  { %vm4786_vm12 = vmpackc.low %vm378_vm5, %vm354_vm4  ;;  %vm472_vm4 = vcmp.eq.s32.totalorder %v5333_v25, %v5978_v48 }
  0xae   :  { %4757 = vmatpush1.bf16.msk.msra.mxu0 %vm4756_vm9, %v5132_v17  ;;  %4787 = vmatprep.subr.msk.bf16.mxu1 %vm4786_vm12, %v5132_v17  ;;  %vm4758_vm15 = vmpackc.low %vm424_vm8, %vm400_vm7  ;;  %vm425_vm7 = vcmp.eq.s32.totalorder %v5307_v23, %v6010_v51  ;;  %vm447_vm9 = vcmp.eq.s32.totalorder %v5330_v24, %v5986_v49  ;;  %vm450_vm12 = vcmp.eq.s32.totalorder %v5330_v24, %v5996_v50 }
  0xaf   :  { %4759 = vmatprep.subr.msk.bf16.mxu0 %vm4758_vm15, %v5132_v17  ;;  %vm4788_vm2 = vmpackc.low %vm377_vm11, %vm353_vm10  ;;  %vm471_vm10 = vcmp.eq.s32.totalorder %v5333_v25, %v5986_v49  ;;  %vm496_vm15 = vcmp.eq.s32.totalorder %v5356_v26, %v5978_v48 }
  0xb0   :  { %4789 = vmatpush1.bf16.msk.msra.mxu1 %vm4788_vm2, %v5132_v17  ;;  %vm4760_vm5 = vmpackc.low %vm423_vm14, %vm399_vm13  ;;  %vm474_vm13 = vcmp.eq.s32.totalorder %v5333_v25, %v5996_v50  ;;  %vm449_vm2 = vcmp.eq.s32.totalorder %v5330_v24, %v6010_v51 }
  0xb1   :  { %vm4790_vm8 = vmpackc.low %vm426_vm1, %vm402_vm0  ;;  %vm520_vm0 = vcmp.eq.s32.totalorder %v5359_v27, %v5978_v48 }
  0xb2   :  { %4761 = vmatpush1.bf16.msk.msra.mxu0 %vm4760_vm5, %v5132_v17  ;;  %4791 = vmatprep.subr.msk.bf16.mxu1 %vm4790_vm8, %v5132_v17  ;;  %vm4762_vm11 = vmpackc.low %vm472_vm4, %vm448_vm3  ;;  %vm473_vm3 = vcmp.eq.s32.totalorder %v5333_v25, %v6010_v51  ;;  %vm495_vm5 = vcmp.eq.s32.totalorder %v5356_v26, %v5986_v49  ;;  %vm498_vm8 = vcmp.eq.s32.totalorder %v5356_v26, %v5996_v50 }
  0xb3   :  { %4763 = vmatprep.subr.msk.bf16.mxu0 %vm4762_vm11, %v5132_v17  ;;  %vm4792_vm14 = vmpackc.low %vm425_vm7, %vm401_vm6  ;;  %vm519_vm6 = vcmp.eq.s32.totalorder %v5359_v27, %v5986_v49  ;;  %vm497_vm11 = vcmp.eq.s32.totalorder %v5356_v26, %v6010_v51 }
  0xb4   :  { %4793 = vmatpush1.bf16.msk.msra.mxu1 %vm4792_vm14, %v5132_v17  ;;  %vm4764_vm1 = vmpackc.low %vm471_vm10, %vm447_vm9  ;;  %vm522_vm9 = vcmp.eq.s32.totalorder %v5359_v27, %v5996_v50  ;;  %vm164_vm14 = vcmp.eq.s32.totalorder %v5165_v2, %v6162_v52 }
  0xb5   :  { %vm4794_vm4 = vmpackc.low %vm474_vm13, %vm450_vm12  ;;  %vm521_vm12 = vcmp.eq.s32.totalorder %v5359_v27, %v6010_v51 }
  0xb6   :  { %4765 = vmatpush1.bf16.msk.msra.mxu0 %vm4764_vm1, %v5132_v17  ;;  %4795 = vmatprep.subr.msk.bf16.mxu1 %vm4794_vm4, %v5132_v17  ;;  %vm4766_vm7 = vmpackc.low %vm520_vm0, %vm496_vm15  ;;  %vm188_vm15 = vcmp.eq.s32.totalorder %v5180_v7, %v6162_v52  ;;  %vm163_vm1 = vcmp.eq.s32.totalorder %v5165_v2, %v6170_v53  ;;  %vm166_vm4 = vcmp.eq.s32.totalorder %v5165_v2, %v6180_v54 }
  0xb7   :  { %4767 = vmatprep.subr.msk.bf16.mxu0 %vm4766_vm7, %v5132_v17  ;;  %vm4796_vm10 = vmpackc.low %vm473_vm3, %vm449_vm2  ;;  %vm187_vm2 = vcmp.eq.s32.totalorder %v5180_v7, %v6170_v53  ;;  %vm212_vm7 = vcmp.eq.s32.totalorder %v5188_v9, %v6162_v52 }
  0xb8   :  { %4797 = vmatpush1.bf16.msk.msra.mxu1 %vm4796_vm10, %v5132_v17  ;;  %vm4768_vm13 = vmpackc.low %vm519_vm6, %vm495_vm5  ;;  %vm190_vm5 = vcmp.eq.s32.totalorder %v5180_v7, %v6180_v54  ;;  %vm165_vm10 = vcmp.eq.s32.totalorder %v5165_v2, %v6194_v55 }
  0xb9   :  { %vm4798_vm0 = vmpackc.low %vm522_vm9, %vm498_vm8  ;;  %vm236_vm8 = vcmp.eq.s32.totalorder %v5191_v10, %v6162_v52 }
  0xba   :  { %4769 = vmatpush1.bf16.msk.msra.mxu0 %vm4768_vm13, %v5132_v17  ;;  %4799 = vmatprep.subr.msk.bf16.mxu1 %vm4798_vm0, %v5132_v17  ;;  %vm4800_vm3 = vmpackc.low %vm521_vm12, %vm497_vm11  ;;  %vm189_vm11 = vcmp.eq.s32.totalorder %v5180_v7, %v6194_v55  ;;  %vm211_vm13 = vcmp.eq.s32.totalorder %v5188_v9, %v6170_v53  ;;  %vm214_vm0 = vcmp.eq.s32.totalorder %v5188_v9, %v6180_v54 }
  0xbb   :  { %vm4802_vm6 = vmpackc.low %vm188_vm15, %vm164_vm14  ;;  %vm235_vm14 = vcmp.eq.s32.totalorder %v5191_v10, %v6170_v53 }
  0xbc   :  { %4801 = vmatpush1.bf16.msk.msra.mxu1 %vm4800_vm3, %v5132_v17  ;;  %4803 = vmatprep.subr.msk.bf16.mxu0 %vm4802_vm6, %v5132_v17  ;;  %vm4804_vm9 = vmpackc.low %vm187_vm2, %vm163_vm1  ;;  %vm238_vm1 = vcmp.eq.s32.totalorder %v5191_v10, %v6180_v54  ;;  %vm260_vm3 = vcmp.eq.s32.totalorder %v5210_v15, %v6162_v52  ;;  %vm213_vm6 = vcmp.eq.s32.totalorder %v5188_v9, %v6194_v55 }
  0xbd   :  { %1976 = vmatmul.mubr.f32.vlgmr.msra.gmra.mrb[16].mxu0 %v6216_v56  ;;  %vm4834_vm12 = vmpackc.low %vm190_vm5, %vm166_vm4  ;;  %vm284_vm4 = vcmp.eq.s32.totalorder %v5213_v16, %v6162_v52 }
  0xbe   :  { %4805 = vmatpush1.bf16.msk.msra.mxu0 %vm4804_vm9, %v5132_v17  ;;  %1981 = vmatprep.mubr.f32.mxu0 %v5131_v1  ;;  %vm4806_vm15 = vmpackc.low %vm236_vm8, %vm212_vm7  ;;  %vm237_vm7 = vcmp.eq.s32.totalorder %v5191_v10, %v6194_v55  ;;  %vm259_vm9 = vcmp.eq.s32.totalorder %v5210_v15, %v6170_v53 }
  0xbf   :  { %4835 = vmatprep.subr.msk.bf16.mxu1 %vm4834_vm12, %v5132_v17  ;;  %2053 = vmatmul.mubr.f32.vlgmr.msra.gmra.mrb[16].mxu1 %v6216_v56  ;;  %vm4836_vm2 = vmpackc.low %vm189_vm11, %vm165_vm10  ;;  %vm283_vm10 = vcmp.eq.s32.totalorder %v5213_v16, %v6170_v53  ;;  %vm262_vm12 = vcmp.eq.s32.totalorder %v5210_v15, %v6180_v54 }
  0xc0   :  { %4807 = vmatprep.subr.msk.bf16.mxu0 %vm4806_vm15, %v5132_v17  ;;  %4837 = vmatpush1.bf16.msk.msra.mxu1 %vm4836_vm2, %v5132_v17  ;;  %vm4808_vm5 = vmpackc.low %vm235_vm14, %vm211_vm13  ;;  %vm286_vm13 = vcmp.eq.s32.totalorder %v5213_v16, %v6180_v54  ;;  %vm308_vm15 = vcmp.eq.s32.totalorder %v5252_v18, %v6162_v52  ;;  %vm261_vm2 = vcmp.eq.s32.totalorder %v5210_v15, %v6194_v55 }
  0xc1   :  { %1982 = vmatmul.mubr.f32.gmra.mrb[18].mxu0 %v6241_v57  ;;  %2058 = vmatprep.mubr.f32.mxu1 %v5131_v1  ;;  %vm4838_vm8 = vmpackc.low %vm238_vm1, %vm214_vm0  ;;  %vm332_vm0 = vcmp.eq.s32.totalorder %v5255_v19, %v6162_v52 }
  0xc2   :  { %4809 = vmatpush1.bf16.msk.msra.mxu0 %vm4808_vm5, %v5132_v17  ;;  %4839 = vmatprep.subr.msk.bf16.mxu1 %vm4838_vm8, %v5132_v17  ;;  %vm4810_vm11 = vmpackc.low %vm284_vm4, %vm260_vm3  ;;  %vm285_vm3 = vcmp.eq.s32.totalorder %v5213_v16, %v6194_v55  ;;  %vm307_vm5 = vcmp.eq.s32.totalorder %v5252_v18, %v6170_v53  ;;  %vm310_vm8 = vcmp.eq.s32.totalorder %v5252_v18, %v6180_v54 }
  0xc3   :  { %2059 = vmatmul.mubr.f32.gmra.mrb[18].mxu1 %v6241_v57  ;;  %4811 = vmatprep.subr.msk.bf16.mxu0 %vm4810_vm11, %v5132_v17  ;;  %vm4840_vm14 = vmpackc.low %vm237_vm7, %vm213_vm6  ;;  %vm331_vm6 = vcmp.eq.s32.totalorder %v5255_v19, %v6170_v53  ;;  %vm356_vm11 = vcmp.eq.s32.totalorder %v5278_v20, %v6162_v52 }
  0xc4   :  { %4841 = vmatpush1.bf16.msk.msra.mxu1 %vm4840_vm14, %v5132_v17  ;;  %vm4812_vm1 = vmpackc.low %vm283_vm10, %vm259_vm9  ;;  %2129 = vmatprep.mubr.f32.mxu0 %v5131_v1  ;;  %vm334_vm9 = vcmp.eq.s32.totalorder %v5255_v19, %v6180_v54  ;;  %vm309_vm14 = vcmp.eq.s32.totalorder %v5252_v18, %v6194_v55 }
  0xc5   :  { %vm4842_vm4 = vmpackc.low %vm286_vm13, %vm262_vm12  ;;  %2206 = vmatprep.mubr.f32.mxu1 %v5131_v1  ;;  %vm380_vm12 = vcmp.eq.s32.totalorder %v5281_v21, %v6162_v52 }
  0xc6   :  { %4813 = vmatpush1.bf16.msk.msra.mxu0 %vm4812_vm1, %v5132_v17  ;;  %4843 = vmatprep.subr.msk.bf16.mxu1 %vm4842_vm4, %v5132_v17  ;;  %vm4814_vm7 = vmpackc.low %vm332_vm0, %vm308_vm15  ;;  %vm333_vm15 = vcmp.eq.s32.totalorder %v5255_v19, %v6194_v55  ;;  %vm355_vm1 = vcmp.eq.s32.totalorder %v5278_v20, %v6170_v53  ;;  %vm358_vm4 = vcmp.eq.s32.totalorder %v5278_v20, %v6180_v54  ;;  %v5133_v19 = vmov 0  }
  0xc7   :  { %4815 = vmatprep.subr.msk.bf16.mxu0 %vm4814_vm7, %v5132_v17  ;;  %vm4844_vm10 = vmpackc.low %vm285_vm3, %vm261_vm2  ;;  %vm379_vm2 = vcmp.eq.s32.totalorder %v5281_v21, %v6170_v53  ;;  %vm404_vm7 = vcmp.eq.s32.totalorder %v5304_v22, %v6162_v52  ;;  %5096 = vset.pattern.permute.xlu0 %v5133_v19 }
  0xc8   :  { %4845 = vmatpush1.bf16.msk.msra.mxu1 %vm4844_vm10, %v5132_v17  ;;  %vm4816_vm13 = vmpackc.low %vm331_vm6, %vm307_vm5  ;;  %vm382_vm5 = vcmp.eq.s32.totalorder %v5281_v21, %v6180_v54  ;;  %vm357_vm10 = vcmp.eq.s32.totalorder %v5278_v20, %v6194_v55  ;;  %v2220_v20 = vld [vmem:[#allocation2 + $0x18] sm:$0xff]  ;;  %5097 = vset.pattern.permute.xlu1 %v5133_v19 }
  0xc9   :  { %vm4846_vm0 = vmpackc.low %vm334_vm9, %vm310_vm8  ;;  %vm428_vm8 = vcmp.eq.s32.totalorder %v5307_v23, %v6162_v52  ;;  %2223 = vperm.xlu0 %5096, %v2220_v20  }
  0xca   :  { %4817 = vmatpush1.bf16.msk.msra.mxu0 %vm4816_vm13, %v5132_v17  ;;  %4847 = vmatprep.subr.msk.bf16.mxu1 %vm4846_vm0, %v5132_v17  ;;  %vm4818_vm3 = vmpackc.low %vm380_vm12, %vm356_vm11  ;;  %vm381_vm11 = vcmp.eq.s32.totalorder %v5281_v21, %v6194_v55  ;;  %vm403_vm13 = vcmp.eq.s32.totalorder %v5304_v22, %v6170_v53  ;;  %vm406_vm0 = vcmp.eq.s32.totalorder %v5304_v22, %v6180_v54 }
  0xcb   :  { %4819 = vmatprep.subr.msk.bf16.mxu0 %vm4818_vm3, %v5132_v17  ;;  %vm4848_vm6 = vmpackc.low %vm333_vm15, %vm309_vm14  ;;  %vm427_vm14 = vcmp.eq.s32.totalorder %v5307_v23, %v6170_v53  ;;  %vm452_vm3 = vcmp.eq.s32.totalorder %v5330_v24, %v6162_v52 }
  0xcc   :  { %4849 = vmatpush1.bf16.msk.msra.mxu1 %vm4848_vm6, %v5132_v17  ;;  %vm4820_vm9 = vmpackc.low %vm379_vm2, %vm355_vm1  ;;  %vm430_vm1 = vcmp.eq.s32.totalorder %v5307_v23, %v6180_v54  ;;  %vm405_vm6 = vcmp.eq.s32.totalorder %v5304_v22, %v6194_v55  ;;  %v6384_v22 = vld [vmem:[#allocation2 + $0x10] sm:$0xff] }
  0xcd   :  { %vm4850_vm12 = vmpackc.low %vm382_vm5, %vm358_vm4  ;;  %vm476_vm4 = vcmp.eq.s32.totalorder %v5333_v25, %v6162_v52 }
  0xce   :  { %4821 = vmatpush1.bf16.msk.msra.mxu0 %vm4820_vm9, %v5132_v17  ;;  %4851 = vmatprep.subr.msk.bf16.mxu1 %vm4850_vm12, %v5132_v17  ;;  %vm4822_vm15 = vmpackc.low %vm428_vm8, %vm404_vm7  ;;  %vm429_vm7 = vcmp.eq.s32.totalorder %v5307_v23, %v6194_v55  ;;  %vm451_vm9 = vcmp.eq.s32.totalorder %v5330_v24, %v6170_v53  ;;  %vm454_vm12 = vcmp.eq.s32.totalorder %v5330_v24, %v6180_v54  ;;  %v3473_v23 = vld [vmem:[#allocation2 + $0xc0] sm:$0xff] }
  0xcf   :  { %4823 = vmatprep.subr.msk.bf16.mxu0 %vm4822_vm15, %v5132_v17  ;;  %vm4852_vm2 = vmpackc.low %vm381_vm11, %vm357_vm10  ;;  %vm475_vm10 = vcmp.eq.s32.totalorder %v5333_v25, %v6170_v53  ;;  %vm500_vm15 = vcmp.eq.s32.totalorder %v5356_v26, %v6162_v52  ;;  %3479 = vperm.xlu0 %5096, %v3473_v23  }
  0xd0   :  { %4853 = vmatpush1.bf16.msk.msra.mxu1 %vm4852_vm2, %v5132_v17  ;;  %vm4824_vm5 = vmpackc.low %vm427_vm14, %vm403_vm13  ;;  %vm478_vm13 = vcmp.eq.s32.totalorder %v5333_v25, %v6180_v54  ;;  %vm453_vm2 = vcmp.eq.s32.totalorder %v5330_v24, %v6194_v55  ;;  %v3476_v24 = vld [vmem:[#allocation2 + $0xd8] sm:$0xff] }
  0xd1   :  { %vm4854_vm8 = vmpackc.low %vm430_vm1, %vm406_vm0  ;;  %vm524_vm0 = vcmp.eq.s32.totalorder %v5359_v27, %v6162_v52 }
  0xd2   :  { %4825 = vmatpush1.bf16.msk.msra.mxu0 %vm4824_vm5, %v5132_v17  ;;  %4855 = vmatprep.subr.msk.bf16.mxu1 %vm4854_vm8, %v5132_v17  ;;  %vm4826_vm11 = vmpackc.low %vm476_vm4, %vm452_vm3  ;;  %vm477_vm3 = vcmp.eq.s32.totalorder %v5333_v25, %v6194_v55  ;;  %vm499_vm5 = vcmp.eq.s32.totalorder %v5356_v26, %v6170_v53  ;;  %vm502_vm8 = vcmp.eq.s32.totalorder %v5356_v26, %v6180_v54 }
  0xd3   :  { %4827 = vmatprep.subr.msk.bf16.mxu0 %vm4826_vm11, %v5132_v17  ;;  %vm4856_vm14 = vmpackc.low %vm429_vm7, %vm405_vm6  ;;  %vm523_vm6 = vcmp.eq.s32.totalorder %v5359_v27, %v6170_v53  ;;  %vm501_vm11 = vcmp.eq.s32.totalorder %v5356_v26, %v6194_v55  ;;  %3494 = vperm.xlu0 %5096, %v3476_v24  }
  0xd4   :  { %4857 = vmatpush1.bf16.msk.msra.mxu1 %vm4856_vm14, %v5132_v17  ;;  %vm4828_vm1 = vmpackc.low %vm475_vm10, %vm451_vm9  ;;  %vm526_vm9 = vcmp.eq.s32.totalorder %v5359_v27, %v6180_v54 }
  0xd5   :  { %vm4858_vm4 = vmpackc.low %vm478_vm13, %vm454_vm12  ;;  %vm525_vm12 = vcmp.eq.s32.totalorder %v5359_v27, %v6194_v55 }
  0xd6   :  { %4829 = vmatpush1.bf16.msk.msra.mxu0 %vm4828_vm1, %v5132_v17  ;;  %4859 = vmatprep.subr.msk.bf16.mxu1 %vm4858_vm4, %v5132_v17  ;;  %vm4830_vm7 = vmpackc.low %vm524_vm0, %vm500_vm15  ;;  %vm2226_vm0 = vcmask 654336   ;;  %vm2963_vm1 = vcmask 64512  }
  0xd7   :  { %4831 = vmatprep.subr.msk.bf16.mxu0 %vm4830_vm7, %v5132_v17  ;;  %vm4860_vm10 = vmpackc.low %vm477_vm3, %vm453_vm2  ;;  %vm5135_vm2 = vmmov 0   ;;  %vm3512_vm3 = vcmask 261120  }
  0xd8   :  { %4861 = vmatpush1.bf16.msk.msra.mxu1 %vm4860_vm10, %v5132_v17  ;;  %vm4832_vm13 = vmpackc.low %vm523_vm6, %vm499_vm5 }
  0xd9   :  { %vm4862_vm14 = vmpackc.low %vm526_vm9, %vm502_vm8 }
  0xda   :  { %4833 = vmatpush1.bf16.msk.msra.mxu0 %vm4832_vm13, %v5132_v17  ;;  %4863 = vmatprep.subr.msk.bf16.mxu1 %vm4862_vm14, %v5132_v17  ;;  %vm4864_vm15 = vmpackc.low %vm525_vm12, %vm501_vm11 }
  0xdc   :  { %4865 = vmatpush1.bf16.msk.msra.mxu1 %vm4864_vm15, %v5132_v17 }
  0xdd   :  { %2130 = vmatmul.mubr.f32.vlgmr.msra.gmra.mrb[20].mxu0 %v6216_v56 }
  0xde   :  { %2135 = vmatprep.mubr.f32.mxu0 %v5131_v1 }
  0xdf   :  { %2207 = vmatmul.mubr.f32.vlgmr.msra.gmra.mrb[20].mxu1 %v6216_v56 }
  0xe0   :  { %2212 = vmatprep.mubr.f32.mxu1 %v5131_v1 }
  0xe1   :  { %2136 = vmatmul.mubr.f32.gmra.mrb[22].mxu0 %v6241_v57 }
  0xe2   :  { %2436 = vmatprep.mubr.f32.mxu0 %v5131_v1 }
  0xe3   :  { %2213 = vmatmul.mubr.f32.gmra.mrb[22].mxu1 %v6241_v57 }
  0xe4   :  { %2294 = vmatprep.mubr.f32.mxu1 %v5131_v1 }
 0x10f   :  { %v1361_v58 = vpop.f32.mrb[0].mxu0 }
 0x110   :  { %v1363_v59 = vpop.f32.mrb[1].mxu0 }
 0x112   :  { %v1438_v60 = vpop.f32.mrb[0].mxu1 }
 0x113   :  { %v1367_v61 = vpop.f32.mrb[2].mxu0  ;;  %v1440_v62 = vpop.f32.mrb[1].mxu1 }
 0x114   :  { %v4868_v63 = vpack.c.bf16 %v1367_v61, %v1361_v58  ;;  %v1369_v0 = vpop.f32.mrb[3].mxu0 }
 0x115   :  { %v4866_v2 = vpack.c.bf16 %v1369_v0, %v1363_v59 }
 0x116   :  { %v1444_v3 = vpop.f32.mrb[2].mxu1 }
 0x117   :  { %v4870_v5 = vpack.c.bf16 %v1444_v3, %v1438_v60  ;;  %4867 = vmatprep.subr.bf16.mxu1 %v4866_v2  ;;  %v1446_v6 = vpop.f32.mrb[3].mxu1 }
 0x118   :  { %v4874_v7 = vpack.c.bf16 %v1446_v6, %v1440_v62  ;;  %4869 = vmatpush1.bf16.msra.mxu1 %v4868_v63 }
 0x119   :  { %4871 = vmatprep.subr.bf16.mxu1 %v4870_v5 }
 0x11c   :  { %4873 = vmatpush1.bf16.msra.mxu1 %v4866_v2 }
 0x11d   :  { %4875 = vmatprep.subr.bf16.mxu1 %v4874_v7 }
 0x120   :  { %4877 = vmatpush1.bf16.msra.mxu1 %v4870_v5 }
 0x130   :  { %v1515_v8 = vpop.f32.mrb[4].mxu0 }
 0x131   :  { %v1517_v9 = vpop.f32.mrb[5].mxu0 }
 0x132   :  { %v1592_v10 = vpop.f32.mrb[4].mxu1 }
 0x133   :  { %v1594_v11 = vpop.f32.mrb[5].mxu1 }
 0x134   :  { %v1521_v12 = vpop.f32.mrb[6].mxu0 }
 0x135   :  { %v4878_v13 = vpack.c.bf16 %v1521_v12, %v1515_v8  ;;  %v1523_v14 = vpop.f32.mrb[7].mxu0 }
 0x136   :  { %v4882_v15 = vpack.c.bf16 %v1523_v14, %v1517_v9  ;;  %v1598_v16 = vpop.f32.mrb[6].mxu1 }
 0x137   :  { %4879 = vmatprep.subr.bf16.mxu1 %v4878_v13  ;;  %v4898_v17 = vpack.c.bf16 %v1598_v16, %v1592_v10  ;;  %v1600_v18 = vpop.f32.mrb[7].mxu1 }
 0x138   :  { %4881 = vmatpush1.bf16.msra.mxu1 %v4874_v7  ;;  %4907 = vmatprep.subr.bf16.mxu0 %v4882_v15  ;;  %v4902_v21 = vpack.c.bf16 %v1600_v18, %v1594_v11  ;;  %v2959_v11 = vld [vmem:[#allocation2 + $0x40] sm:$0xff] }
 0x139   :  { %4883 = vmatprep.subr.bf16.mxu1 %v4882_v15  ;;  %4909 = vmatpush1.bf16.msra.mxu0 %v4878_v13 }
 0x13a   :  { %4911 = vmatprep.subr.bf16.mxu0 %v4898_v17 }
 0x13c   :  { %4885 = vmatpush1.bf16.msra.mxu1 %v4878_v13 }
 0x13d   :  { %4887 = vmatprep.subr.bf16.mxu1 %v4874_v7  ;;  %4913 = vmatpush1.bf16.msra.mxu0 %v4882_v15 }
 0x13e   :  { %4915 = vmatprep.subr.bf16.mxu0 %v4902_v21 }
 0x13f   :  { %4370 = vmatmul.mubr.msk.f32.vlgmr.msra.gmra.mrb[24].mxu1 %vm2226_vm0, %v6384_v22 }
 0x140   :  { %4889 = vmatpush1.bf16.msra.mxu1 %v4870_v5  ;;  %2365 = vmatprep.mubr.f32.mxu1 %v5131_v1 }
 0x141   :  { %4891 = vmatprep.subr.bf16.mxu1 %v4878_v13  ;;  %4917 = vmatpush1.bf16.msra.mxu0 %v4898_v17 }
 0x144   :  { %4893 = vmatpush1.bf16.msra.mxu1 %v4874_v7 }
 0x145   :  { %4895 = vmatprep.subr.bf16.mxu1 %v4882_v15 }
 0x148   :  { %4897 = vmatpush1.bf16.msra.mxu1 %v4878_v13  ;;  %v6415_v12 = vpop.permute.xlu0 %2223 }
 0x149   :  { %4899 = vmatprep.subr.bf16.mxu1 %v4898_v17 }
 0x14c   :  { %4901 = vmatpush1.bf16.msra.mxu1 %v4882_v15 }
 0x14d   :  { %4903 = vmatprep.subr.bf16.mxu1 %v4902_v21 }
 0x150   :  { %v1669_v25 = vpop.f32.mrb[8].mxu0  ;;  %4905 = vmatpush1.bf16.msra.mxu1 %v4898_v17 }
 0x151   :  { %v1671_v26 = vpop.f32.mrb[9].mxu0  ;;  %4927 = vmatprep.subr.bf16.mxu1 %v4902_v21 }
 0x152   :  { %v1746_v27 = vpop.f32.mrb[8].mxu1 }
 0x153   :  { %4371 = vmatmul.mubr.msk.f32.vlgmr.msra.gmra.mrb[26].mxu1 %vm2226_vm0, %v6384_v22  ;;  %v1748_v28 = vpop.f32.mrb[9].mxu1 }
 0x154   :  { %v1675_v29 = vpop.f32.mrb[10].mxu0  ;;  %4929 = vmatpush1.bf16.msra.mxu1 %v4898_v17  ;;  %2507 = vmatprep.mubr.f32.mxu1 %v5131_v1 }
 0x155   :  { %v4918_v30 = vpack.c.bf16 %v1675_v29, %v1669_v25  ;;  %v1677_v31 = vpop.f32.mrb[11].mxu0  ;;  %v3475_v25 = vld [vmem:[#allocation2 + $0xd0] sm:$0xff] }
 0x156   :  { %v4922_v32 = vpack.c.bf16 %v1677_v31, %v1671_v26  ;;  %v1752_v33 = vpop.f32.mrb[10].mxu1  ;;  %v3506_v26 = vld [vmem:[#allocation2 + $0xe8] sm:$0x1] }
 0x157   :  { %4919 = vmatprep.subr.bf16.mxu0 %v4918_v30  ;;  %4931 = vmatprep.subr.bf16.mxu1 %v4918_v30  ;;  %v4938_v34 = vpack.c.bf16 %v1752_v33, %v1746_v27  ;;  %v1754_v35 = vpop.f32.mrb[11].mxu1 }
 0x158   :  { %4921 = vmatpush1.bf16.msra.mxu0 %v4902_v21  ;;  %4933 = vmatpush1.bf16.msra.mxu1 %v4902_v21  ;;  %v4942_v36 = vpack.c.bf16 %v1754_v35, %v1748_v28  ;;  %v3474_v21 = vld [vmem:[#allocation2 + $0xc8] sm:$0xff] }
 0x159   :  { %4923 = vmatprep.subr.bf16.mxu0 %v4922_v32  ;;  %4935 = vmatprep.subr.bf16.mxu1 %v4922_v32 }
 0x15a   :  { %3484 = vperm.xlu1 %5097, %v3474_v21  }
 0x15c   :  { %4925 = vmatpush1.bf16.msra.mxu0 %v4918_v30  ;;  %4937 = vmatpush1.bf16.msra.mxu1 %v4918_v30 }
 0x15d   :  { %4939 = vmatprep.subr.bf16.mxu1 %v4938_v34  ;;  %4947 = vmatprep.subr.bf16.mxu0 %v4922_v32 }
 0x15e   :  { %3489 = vperm.xlu1 %5097, %v3475_v25  }
 0x15f   :  { %4372 = vmatmul.mubr.msk.f32.vlgmr.msra.gmra.mrb[24].mxu0 %vm2226_vm0, %v6384_v22 }
 0x160   :  { %4941 = vmatpush1.bf16.msra.mxu1 %v4922_v32  ;;  %4949 = vmatpush1.bf16.msra.mxu0 %v4918_v30 }
 0x161   :  { %4943 = vmatprep.subr.bf16.mxu1 %v4942_v36  ;;  %4951 = vmatprep.subr.bf16.mxu0 %v4938_v34 }
 0x162   :  { %2578 = vmatprep.mubr.f32.mxu0 %v5131_v1  ;;  %3509 = vperm.xlu1 %5097, %v3506_v26   ;;  %v3369_v26 = vld [vmem:[#allocation2 + $0xa8] sm:$0xff] }
 0x164   :  { %4945 = vmatpush1.bf16.msra.mxu1 %v4938_v34  ;;  %4953 = vmatpush1.bf16.msra.mxu0 %v4922_v32 }
 0x165   :  { %4955 = vmatprep.subr.bf16.mxu0 %v4942_v36  ;;  %4967 = vmatprep.subr.bf16.mxu1 %v4942_v36 }
 0x167   :  { %4373 = vmatmul.mubr.msk.f32.vlgmr.msra.gmra.mrb[28].mxu1 %vm2226_vm0, %v6384_v22 }
 0x168   :  { %4957 = vmatpush1.bf16.msra.mxu0 %v4938_v34  ;;  %4969 = vmatpush1.bf16.msra.mxu1 %v4938_v34 }
 0x169   :  { %2649 = vmatprep.mubr.f32.mxu1 %v5131_v1 }
 0x170   :  { %v1823_v37 = vpop.f32.mrb[12].mxu0 }
 0x171   :  { %v1825_v38 = vpop.f32.mrb[13].mxu0 }
 0x172   :  { %v1900_v39 = vpop.f32.mrb[12].mxu1 }
 0x173   :  { %v1902_v40 = vpop.f32.mrb[13].mxu1 }
 0x174   :  { %v1829_v41 = vpop.f32.mrb[14].mxu0 }
 0x175   :  { %v4958_v42 = vpack.c.bf16 %v1829_v41, %v1823_v37  ;;  %v1831_v43 = vpop.f32.mrb[15].mxu0  ;;  %v2955_v41 = vld [vmem:[#allocation2 + $0x20] sm:$0xff] }
 0x176   :  { %v4962_v44 = vpack.c.bf16 %v1831_v43, %v1825_v38  ;;  %v1906_v45 = vpop.f32.mrb[14].mxu1  ;;  %v2960_v38 = vld [vmem:[#allocation2 + $0x48] sm:$0xff]  ;;  %v2957_v43 = vld [vmem:[#allocation2 + $0x30] sm:$0xff] }
 0x177   :  { %4959 = vmatprep.subr.bf16.mxu0 %v4958_v42  ;;  %4971 = vmatprep.subr.bf16.mxu1 %v4958_v42  ;;  %v4978_v46 = vpack.c.bf16 %v1906_v45, %v1900_v39  ;;  %v1908_v47 = vpop.f32.mrb[15].mxu1  ;;  %v2961_v39 = vld [vmem:[#allocation2 + $0x50] sm:$0xff]  ;;  %v3158_v45 = vld [vmem:[#allocation2 + $0x60] sm:$0xff] }
 0x178   :  { %4961 = vmatpush1.bf16.msra.mxu0 %v4942_v36  ;;  %4973 = vmatpush1.bf16.msra.mxu1 %v4942_v36  ;;  %v4982_v48 = vpack.c.bf16 %v1908_v47, %v1902_v40  ;;  %v2962_v40 = vld [vmem:[#allocation2 + $0x58] sm:$0xff] }
 0x179   :  { %4963 = vmatprep.subr.bf16.mxu0 %v4962_v44  ;;  %4975 = vmatprep.subr.bf16.mxu1 %v4962_v44 }
 0x17c   :  { %4965 = vmatpush1.bf16.msra.mxu0 %v4958_v42  ;;  %4977 = vmatpush1.bf16.msra.mxu1 %v4958_v42 }
 0x17d   :  { %4979 = vmatprep.subr.bf16.mxu1 %v4978_v46  ;;  %4987 = vmatprep.subr.bf16.mxu0 %v4962_v44 }
 0x17f   :  { %4374 = vmatmul.mubr.msk.f32.vlgmr.msra.gmra.mrb[26].mxu0 %vm2226_vm0, %v6384_v22 }
 0x180   :  { %4981 = vmatpush1.bf16.msra.mxu1 %v4962_v44  ;;  %4989 = vmatpush1.bf16.msra.mxu0 %v4958_v42  ;;  %v2956_v42 = vld [vmem:[#allocation2 + $0x28] sm:$0xff] }
 0x181   :  { %4983 = vmatprep.subr.bf16.mxu1 %v4982_v48  ;;  %4991 = vmatprep.subr.bf16.mxu0 %v4978_v46 }
 0x182   :  { %2720 = vmatprep.mubr.f32.mxu0 %v5131_v1 }
 0x184   :  { %4985 = vmatpush1.bf16.msra.mxu1 %v4978_v46  ;;  %4993 = vmatpush1.bf16.msra.mxu0 %v4962_v44  ;;  %v2958_v44 = vld [vmem:[#allocation2 + $0x38] sm:$0xff] }
 0x185   :  { %4995 = vmatprep.subr.bf16.mxu0 %v4982_v48  ;;  %5007 = vmatprep.subr.bf16.mxu1 %v4982_v48 }
 0x187   :  { %4375 = vmatmul.mubr.msk.f32.vlgmr.msra.gmra.mrb[30].mxu1 %vm2226_vm0, %v6384_v22 }
 0x188   :  { %4997 = vmatpush1.bf16.msra.mxu0 %v4978_v46  ;;  %5009 = vmatpush1.bf16.msra.mxu1 %v4978_v46 }
 0x189   :  { %2791 = vmatprep.mubr.f32.mxu1 %v5131_v1 }
 0x190   :  { %v1977_v49 = vpop.f32.mrb[16].mxu0 }
 0x191   :  { %v1979_v50 = vpop.f32.mrb[17].mxu0 }
 0x192   :  { %v2054_v51 = vpop.f32.mrb[16].mxu1 }
 0x193   :  { %v2056_v52 = vpop.f32.mrb[17].mxu1 }
 0x194   :  { %v1983_v53 = vpop.f32.mrb[18].mxu0 }
 0x195   :  { %v4998_v54 = vpack.c.bf16 %v1983_v53, %v1977_v49  ;;  %v1985_v55 = vpop.f32.mrb[19].mxu0 }
 0x196   :  { %v5002_v56 = vpack.c.bf16 %v1985_v55, %v1979_v50  ;;  %v2060_v57 = vpop.f32.mrb[18].mxu1 }
 0x197   :  { %4999 = vmatprep.subr.bf16.mxu0 %v4998_v54  ;;  %5011 = vmatprep.subr.bf16.mxu1 %v4998_v54  ;;  %v5018_v58 = vpack.c.bf16 %v2060_v57, %v2054_v51  ;;  %v2062_v59 = vpop.f32.mrb[19].mxu1  ;;  %v3159_v57 = vld [vmem:[#allocation2 + $0x68] sm:$0xff] }
 0x198   :  { %5001 = vmatpush1.bf16.msra.mxu0 %v4982_v48  ;;  %5013 = vmatpush1.bf16.msra.mxu1 %v4982_v48  ;;  %v5022_v60 = vpack.c.bf16 %v2062_v59, %v2056_v52  ;;  %v3161_v59 = vld [vmem:[#allocation2 + $0x78] sm:$0xff] }
 0x199   :  { %5003 = vmatprep.subr.bf16.mxu0 %v5002_v56  ;;  %5015 = vmatprep.subr.bf16.mxu1 %v5002_v56 }
 0x19c   :  { %5005 = vmatpush1.bf16.msra.mxu0 %v4998_v54  ;;  %5017 = vmatpush1.bf16.msra.mxu1 %v4998_v54 }
 0x19d   :  { %5019 = vmatprep.subr.bf16.mxu1 %v5018_v58  ;;  %5027 = vmatprep.subr.bf16.mxu0 %v5002_v56 }
 0x19f   :  { %4376 = vmatmul.mubr.msk.f32.vlgmr.msra.gmra.mrb[28].mxu0 %vm2226_vm0, %v6384_v22 }
 0x1a0   :  { %5021 = vmatpush1.bf16.msra.mxu1 %v5002_v56  ;;  %5029 = vmatpush1.bf16.msra.mxu0 %v4998_v54 }
 0x1a1   :  { %5023 = vmatprep.subr.bf16.mxu1 %v5022_v60  ;;  %5031 = vmatprep.subr.bf16.mxu0 %v5018_v58 }
 0x1a2   :  { %2862 = vmatprep.mubr.f32.mxu0 %v5131_v1 }
 0x1a4   :  { %5025 = vmatpush1.bf16.msra.mxu1 %v5018_v58  ;;  %5033 = vmatpush1.bf16.msra.mxu0 %v5002_v56 }
 0x1a5   :  { %5035 = vmatprep.subr.bf16.mxu0 %v5022_v60  ;;  %5047 = vmatprep.subr.bf16.mxu1 %v5022_v60 }
 0x1a7   :  { %4377 = vmatmul.mubr.msk.f32.vlgmr.msra.gmra.mrb[32].mxu1 %vm2226_vm0, %v6384_v22 }
 0x1a8   :  { %5037 = vmatpush1.bf16.msra.mxu0 %v5018_v58  ;;  %5049 = vmatpush1.bf16.msra.mxu1 %v5018_v58  ;;  %v3160_v58 = vld [vmem:[#allocation2 + $0x70] sm:$0xff] }
 0x1a9   :  { %2933 = vmatprep.mubr.f32.mxu1 %v5131_v1 }
 0x1b0   :  { %v2131_v61 = vpop.f32.mrb[20].mxu0 }
 0x1b1   :  { %v2133_v62 = vpop.f32.mrb[21].mxu0 }
 0x1b2   :  { %v2208_v63 = vpop.f32.mrb[20].mxu1 }
 0x1b3   :  { %v2210_v0 = vpop.f32.mrb[21].mxu1 }
 0x1b4   :  { %v2137_v2 = vpop.f32.mrb[22].mxu0 }
 0x1b5   :  { %v5038_v3 = vpack.c.bf16 %v2137_v2, %v2131_v61  ;;  %v2139_v5 = vpop.f32.mrb[23].mxu0 }
 0x1b6   :  { %v5042_v6 = vpack.c.bf16 %v2139_v5, %v2133_v62  ;;  %v2214_v7 = vpop.f32.mrb[22].mxu1 }
 0x1b7   :  { %v5058_v8 = vpack.c.bf16 %v2214_v7, %v2208_v63  ;;  %5039 = vmatprep.subr.bf16.mxu0 %v5038_v3  ;;  %5051 = vmatprep.subr.bf16.mxu1 %v5038_v3  ;;  %v2216_v9 = vpop.f32.mrb[23].mxu1 }
 0x1b8   :  { %v5062_v10 = vpack.c.bf16 %v2216_v9, %v2210_v0  ;;  %5041 = vmatpush1.bf16.msra.mxu0 %v5022_v60  ;;  %5053 = vmatpush1.bf16.msra.mxu1 %v5022_v60  ;;  %v3263_v60 = vld [vmem:[#allocation2 + $0x80] sm:$0xff] }
 0x1b9   :  { %5043 = vmatprep.subr.bf16.mxu0 %v5042_v6  ;;  %5055 = vmatprep.subr.bf16.mxu1 %v5042_v6 }
 0x1bc   :  { %5045 = vmatpush1.bf16.msra.mxu0 %v5038_v3  ;;  %5057 = vmatpush1.bf16.msra.mxu1 %v5038_v3 }
 0x1bd   :  { %5059 = vmatprep.subr.bf16.mxu1 %v5058_v8 }
 0x1bf   :  { %4378 = vmatmul.mubr.msk.f32.vlgmr.msra.gmra.mrb[30].mxu0 %vm2226_vm0, %v6384_v22 }
 0x1c0   :  { %5061 = vmatpush1.bf16.msra.mxu1 %v5042_v6  ;;  %4433 = vmatprep.mubr.msk.f32.mxu0 %vm2963_vm1, %v2959_v11  ;;  %v3265_v11 = vld [vmem:[#allocation2 + $0x90] sm:$0xff] }
 0x1c1   :  { %5063 = vmatprep.subr.bf16.mxu1 %v5062_v10  ;;  %v3264_v10 = vld [vmem:[#allocation2 + $0x88] sm:$0xff] }
 0x1c4   :  { %5065 = vmatpush1.bf16.msra.mxu1 %v5058_v8 }
 0x1c7   :  { %4379 = vmatmul.mubr.msk.f32.vlgmr.msra.gmra.mrb[34].mxu1 %vm2226_vm0, %v6384_v22 }
 0x212   :  { %v2296_v13 = vpop.f32.mrb[24].mxu1 }
 0x213   :  { %v2297_v14 = vadd.f32 %v2296_v13, %v6415_v12  ;;  %v2298_v15 = vpop.f32.mrb[25].mxu1  ;;  %v3266_v13 = vld [vmem:[#allocation2 + $0x98] sm:$0xff] }
 0x214   :  { %v2299_v16 = vadd.f32 %v2298_v15, %v6415_v12 }
 0x216   :  { %v2940_v17 = vmax.f32 %v2297_v14, %v2299_v16  ;;  %v3368_v14 = vld [vmem:[#allocation2 + $0xa0] sm:$0xff] }
 0x226   :  { %v2367_v18 = vpop.f32.mrb[26].mxu1 }
 0x227   :  { %v2368_v19 = vadd.f32 %v2367_v18, %v6415_v12  ;;  %v2369_v20 = vpop.f32.mrb[27].mxu1 }
 0x228   :  { %v2370_v23 = vadd.f32 %v2369_v20, %v6415_v12 }
 0x229   :  { %v2945_v24 = vmax.f32 %v2940_v17, %v2368_v19 }
 0x22b   :  { %v2950_v22 = vmax.f32 %v2945_v24, %v2370_v23 }
 0x232   :  { %v2438_v27 = vpop.f32.mrb[24].mxu0 }
 0x233   :  { %v2439_v28 = vadd.f32 %v2438_v27, %v6415_v12  ;;  %v2440_v29 = vpop.f32.mrb[25].mxu0  ;;  %v3370_v27 = vld [vmem:[#allocation2 + $0xb0] sm:$0xff] }
 0x234   :  { %v2441_v30 = vadd.f32 %v2440_v29, %v6415_v12  ;;  %v5134_v29 = vmov 0.0|0.0  }
 0x236   :  { %v2941_v31 = vmax.f32 %v2439_v28, %v2441_v30  ;;  %v3371_v28 = vld [vmem:[#allocation2 + $0xb8] sm:$0xff]  ;;  %v3480_v30 = vpop.permute.xlu0 %3479 }
 0x23a   :  { %v2509_v32 = vpop.f32.mrb[28].mxu1 }
 0x23b   :  { %v2510_v33 = vadd.f32 %v2509_v32, %v6415_v12  ;;  %v2511_v34 = vpop.f32.mrb[29].mxu1 }
 0x23c   :  { %v2512_v35 = vadd.f32 %v2511_v34, %v6415_v12 }
 0x23d   :  { %v2946_v36 = vmax.f32 %v2941_v31, %v2510_v33 }
 0x23f   :  { %v2951_v37 = vmax.f32 %v2946_v36, %v2512_v35  ;;  %v3495_v36 = vpop.permute.xlu0 %3494 }
 0x241   :  { %4431 = vmatprep.subr.mxu0 %v2951_v37 }
 0x242   :  { %4432 = vmatpush3.msra.mxu0 %v2951_v37 }
 0x243   :  { %4439 = vmatprep.subr.mxu0 %v2950_v22  ;;  %4434 = vmatmul.mubr.msk.f32.vlgmr.msra.gmra.mrb[32].mxu0 %vm2963_vm1, %v2960_v38 }
 0x244   :  { %4440 = vmatpush3.msra.mxu0 %v2950_v22  ;;  %4436 = vmatprep.mubr.msk.f32.mxu0 %vm2963_vm1, %v2961_v39 }
 0x247   :  { %4437 = vmatmul.mubr.msk.f32.gmra.mrb[34].mxu0 %vm2963_vm1, %v2962_v40 }
 0x248   :  { %4441 = vmatprep.mubr.msk.f32.mxu0 %vm2963_vm1, %v2955_v41 }
 0x24b   :  { %4442 = vmatmul.mubr.msk.f32.vlgmr.msra.gmra.mrb[32].mxu0 %vm2963_vm1, %v2956_v42 }
 0x24c   :  { %4444 = vmatprep.mubr.msk.f32.mxu0 %vm2963_vm1, %v2957_v43 }
 0x24f   :  { %4445 = vmatmul.mubr.msk.f32.gmra.mrb[34].mxu0 %vm2963_vm1, %v2958_v44 }
 0x250   :  { %4449 = vmatprep.mubr.msk.f32.mxu0 %vm2963_vm1, %v3158_v45 }
 0x252   :  { %v2580_v46 = vpop.f32.mrb[26].mxu0 }
 0x253   :  { %v2581_v47 = vadd.f32 %v2580_v46, %v6415_v12  ;;  %v2582_v48 = vpop.f32.mrb[27].mxu0  ;;  %v3505_v46 = vld [vmem:[#allocation2 + $0xe0] sm:$0x1] }
 0x254   :  { %v2583_v49 = vadd.f32 %v2582_v48, %v6415_v12 }
 0x256   :  { %v2942_v50 = vmax.f32 %v2581_v47, %v2583_v49 }
 0x25a   :  { %v2651_v51 = vpop.f32.mrb[30].mxu1 }
 0x25b   :  { %v2652_v52 = vadd.f32 %v2651_v51, %v6415_v12  ;;  %v2653_v53 = vpop.f32.mrb[31].mxu1 }
 0x25c   :  { %v2654_v54 = vadd.f32 %v2653_v53, %v6415_v12 }
 0x25d   :  { %v2947_v55 = vmax.f32 %v2942_v50, %v2652_v52 }
 0x25f   :  { %v2952_v56 = vmax.f32 %v2947_v55, %v2654_v54 }
 0x261   :  { %4447 = vmatprep.subr.mxu0 %v2952_v56 }
 0x262   :  { %4448 = vmatpush3.msra.mxu0 %v2952_v56 }
 0x263   :  { %4450 = vmatmul.mubr.msk.f32.vlgmr.msra.gmra.mrb[32].mxu0 %vm2963_vm1, %v3159_v57 }
 0x264   :  { %4452 = vmatprep.mubr.msk.f32.mxu0 %vm2963_vm1, %v3160_v58 }
 0x267   :  { %4453 = vmatmul.mubr.msk.f32.gmra.mrb[34].mxu0 %vm2963_vm1, %v3161_v59 }
 0x268   :  { %4457 = vmatprep.mubr.msk.f32.mxu0 %vm2963_vm1, %v3263_v60 }
 0x272   :  { %v2722_v61 = vpop.f32.mrb[28].mxu0 }
 0x273   :  { %v2723_v62 = vadd.f32 %v2722_v61, %v6415_v12  ;;  %v2724_v63 = vpop.f32.mrb[29].mxu0 }
 0x274   :  { %v2725_v0 = vadd.f32 %v2724_v63, %v6415_v12 }
 0x276   :  { %v2943_v2 = vmax.f32 %v2723_v62, %v2725_v0 }
 0x27a   :  { %v2793_v3 = vpop.f32.mrb[32].mxu1 }
 0x27b   :  { %v2794_v5 = vadd.f32 %v2793_v3, %v6415_v12  ;;  %v2795_v6 = vpop.f32.mrb[33].mxu1 }
 0x27c   :  { %v2796_v7 = vadd.f32 %v2795_v6, %v6415_v12 }
 0x27d   :  { %v2948_v8 = vmax.f32 %v2943_v2, %v2794_v5 }
 0x27f   :  { %v2953_v9 = vmax.f32 %v2948_v8, %v2796_v7 }
 0x281   :  { %4455 = vmatprep.subr.mxu0 %v2953_v9 }
 0x282   :  { %4456 = vmatpush3.msra.mxu0 %v2953_v9 }
 0x283   :  { %4458 = vmatmul.mubr.msk.f32.vlgmr.msra.gmra.mrb[32].mxu0 %vm2963_vm1, %v3264_v10 }
 0x284   :  { %4460 = vmatprep.mubr.msk.f32.mxu0 %vm2963_vm1, %v3265_v11 }
 0x287   :  { %4461 = vmatmul.mubr.msk.f32.gmra.mrb[34].mxu0 %vm2963_vm1, %v3266_v13 }
 0x288   :  { %4465 = vmatprep.mubr.msk.f32.mxu0 %vm2963_vm1, %v3368_v14 }
 0x292   :  { %v2864_v15 = vpop.f32.mrb[30].mxu0 }
 0x293   :  { %v2865_v16 = vadd.f32 %v2864_v15, %v6415_v12  ;;  %v2866_v17 = vpop.f32.mrb[31].mxu0 }
 0x294   :  { %v2867_v18 = vadd.f32 %v2866_v17, %v6415_v12 }
 0x296   :  { %v2944_v19 = vmax.f32 %v2865_v16, %v2867_v18 }
 0x29a   :  { %v2935_v20 = vpop.f32.mrb[34].mxu1 }
 0x29b   :  { %v2936_v21 = vadd.f32 %v2935_v20, %v6415_v12  ;;  %v2937_v23 = vpop.f32.mrb[35].mxu1 }
 0x29c   :  { %v2938_v24 = vadd.f32 %v2937_v23, %v6415_v12  ;;  %v3485_v12 = vpop.permute.xlu1 %3484 }
 0x29d   :  { %v2949_v25 = vmax.f32 %v2944_v19, %v2936_v21 }
 0x29f   :  { %v2954_v22 = vmax.f32 %v2949_v25, %v2938_v24 }
 0x2a0   :  { %v3490_v39 = vpop.permute.xlu1 %3489 }
 0x2a1   :  { %4463 = vmatprep.subr.mxu0 %v2954_v22 }
 0x2a2   :  { %4464 = vmatpush3.msra.mxu0 %v2954_v22 }
 0x2a3   :  { %4466 = vmatmul.mubr.msk.f32.vlgmr.msra.gmra.mrb[32].mxu0 %vm2963_vm1, %v3369_v26  ;;  %5066 = vmatprep.subr.bf16.mxu0 %v5134_v29 }
 0x2a4   :  { %4468 = vmatprep.mubr.msk.f32.mxu0 %vm2963_vm1, %v3370_v27  ;;  %v3510_v47 = vpop.permute.xlu1 %3509 }
 0x2a7   :  { %4469 = vmatmul.mubr.msk.f32.gmra.mrb[34].mxu0 %vm2963_vm1, %v3371_v28 }
 0x2a8   :  { %4479 = vmatprep.mubr.msk.f32.mxu0 %vm5135_vm2, %v5131_v1 }
 0x376   :  { %v4467_v31 = vpop.f32.mrb[32].mxu0 }
 0x377   :  { %v3498_v32 = vadd.f32 %v4467_v31, %v3485_v12  ;;  %v3450_v33 = vpop.f32.mrb[33].mxu0 }
 0x378   :  { %v3497_v34 = vadd.f32 %v3480_v30, %v3450_v33 }
 0x379   :  { %v3502_v35 = vmax.f32 %v3498_v32, 0.0 }
 0x37a   :  { %v3501_v37 = vmax.f32 %v3497_v34, 0.0  ;;  %v4470_v38 = vpop.f32.mrb[34].mxu0 }
 0x37b   :  { %v3500_v40 = vadd.f32 %v4470_v38, %v3495_v36  ;;  %v3460_v41 = vpop.f32.mrb[35].mxu0 }
 0x37c   :  { %v5067_v42 = vpack.c.bf16 %v3502_v35, %v3501_v37  ;;  %v3499_v43 = vadd.f32 %v3490_v39, %v3460_v41 }
 0x37d   :  { %v3504_v44 = vmax.f32 %v3500_v40, 0.0 }
 0x37e   :  { %v3503_v45 = vmax.f32 %v3499_v43, 0.0  ;;  %5068 = vmatpush3.bf16.msra.mxu0 %v5067_v42 }
 0x37f   :  { %5069 = vmatprep.subr.bf16.mxu0 %v5134_v29 }
 0x380   :  { %v5070_v1 = vpack.c.bf16 %v3504_v44, %v3503_v45 }
 0x382   :  { %5071 = vmatpush3.bf16.msra.mxu0 %v5070_v1 }
 0x385   :  { %4480 = vmatmul.mubr.msk.f32.vlgmr.msra.gmra.mrb[36].mxu0 %vm3512_vm3, %v3505_v46 }
 0x458   :  { %v3582_v48 = vpop.f32.mrb[36].mxu0 }
 0x459   :  { %v3583_v49 = vadd.f32 %v3582_v48, %v3510_v47  ;;  %v4481_v50 = vpop.f32.mrb[37].mxu0 }
 0x45b   :  { %v3586_v51 = vsub.f32 0.0, %v3583_v49 }
 0x45d   :  { %v3587_v52 = vmul.f32 1.442695, %v3586_v51 }
 0x45f   :  { %5098 = vpow2.f32 %v3587_v52 }
 0x469   :  { %v5099_v53 = vpop.eup %5098 }
 0x46a   :  { %v3589_v54 = vadd.f32 1.0, %v5099_v53 }
 0x46c   :  { %5100 = vrcp.f32 %v3589_v54 }
 0x476   :  { %v5101_v55 = vpop.eup %5100 }
 0x477   :  { %v3595_v56 = vrot.slane %v5101_v55, %v5171_v4 }
 0x479   :  { %3596 = vst [vmem:[%s6463_s2] sm:$0xff] %v3595_v56 }
 0x47a   :  { %3601 = vsyncpa [#allocation3], 1 }

</bundles_post_ra>
